<compile_context>
chip_gen: v7x
topology: tpu7x:2x2x1
jax: 0.10.0
libtpu: 0.0.40
codegen_flags: <defaults>
</compile_context>

<pallas_src>
import math
import functools

import numpy as np
import jax
import jax.numpy as jnp
from jax.experimental import pallas as pl
from jax.experimental.pallas import tpu as pltpu

_LANE = 128


def _round_up(x, m):
    return (x + m - 1) // m * m


# ----------------------------------------------------------------------------
# host (numpy) glue
# ----------------------------------------------------------------------------
def _linear_interp_matrix(in_size, out_size):
    """Weights of F.interpolate(mode='linear'/'trilinear', align_corners=False)."""
    w = np.zeros((out_size, in_size), dtype=np.float32)
    scale = in_size / out_size
    for o in range(out_size):
        src = (o + 0.5) * scale - 0.5
        if src < 0.0:
            src = 0.0
        i0 = min(int(math.floor(src)), in_size - 1)
        i1 = min(i0 + 1, in_size - 1)
        l1 = src - i0
        w[o, i0] += 1.0 - l1
        w[o, i1] += l1
    return w


def _dim_t(embed, temperature):
    half = embed // 3
    num = half + half % 2
    idx = np.arange(num, dtype=np.float64)
    return (temperature ** (2.0 * np.floor(idx / 2.0) / float(half))).astype(np.float32)


def _tpu_vmem_capacity_bytes():
    try:
        return int(pltpu.get_tpu_info().vmem_capacity_bytes)
    except Exception:
        return 64 << 20            # conservative (v7x-sized) fallback


# ----------------------------------------------------------------------------
# Pallas kernel: one channels-last spatial tile per grid step
# ----------------------------------------------------------------------------
def _pe3d_kernel(ang_ref, wyx_ref, zpart_ref, rowsum_ref, out_ref, *, apply_rowsum):
    # ang_ref    : (t_hw, 2*num)     precomputed angles pos*inv + phase (y | x)
    # wyx_ref    : (2*num, E)        fused y|x channel-fit weights (rows of Wc.T)
    # zpart_ref  : (out_d, 1, E)     hoisted (Wz @ enc_z @ WcT_z)
    # rowsum_ref : (out_d, 1, 1)     Wz row sums (only read when apply_rowsum)
    # out_ref    : (out_d, t_hw, E)  channels-last output tile
    enc = jnp.sin(ang_ref[...])                                           # EUP pass
    yx = jnp.dot(enc, wyx_ref[...], preferred_element_type=jnp.float32)   # (t_hw, E)
    yx3 = yx[None, :, :]                                                   # (1, t_hw, E)
    if apply_rowsum:                       # statically dead when row sums == 1
        yx3 = rowsum_ref[...] * yx3
    out_ref[...] = (zpart_ref[...] + yx3).astype(out_ref.dtype)            # one block store


# ----------------------------------------------------------------------------
# Module wrapper (per-shape caching of weights + jitted pallas_call)
# ----------------------------------------------------------------------------
class PositionalEncodingSine3D:
    def __init__(self, embed_size=64, z_size=36, fit_mode='interpolate',
                 temperature=10000, normalize=False, scale=None,
                 out_dtype=jnp.float32):
        if scale is not None and normalize is False:
            raise ValueError('normalize should be True if scale is passed')
        if scale is None:
            scale = 2 * math.pi
        self.embed_size = embed_size
        self.z_size = z_size
        self.fit_mode = fit_mode
        self.temperature = temperature
        self.normalize = normalize
        self.scale = scale
        self.out_dtype = out_dtype
        self._cache = {}

    def __call__(self, scan):
        key = tuple(int(s) for s in scan.shape)
        entry = self._cache.get(key)
        if entry is None:
            entry = self._build(key)
            self._cache[key] = entry
        fn, args = entry
        return fn(*args)

    # ------------------------------------------------------------------
    def _build(self, shape):
        d, embed, h, w = shape
        z_size = self.z_size
        half = embed // 3
        num = half + half % 2
        c3 = 3 * num
        two_num = 2 * num
        hw = h * w
        eps = 1e-6

        inv = (1.0 / _dim_t(embed, self.temperature)).astype(np.float32)      # (num,)
        phase = np.where(np.arange(num) % 2 == 0, 0.0, np.pi / 2.0).astype(np.float32)

        needs_fit = (c3 != embed) or (z_size != d)
        if not needs_fit:
            wz = np.eye(z_size, dtype=np.float32)
            wc = np.eye(c3, dtype=np.float32)
            out_d, out_embed = z_size, c3
        elif self.fit_mode == 'interpolate':
            wz = _linear_interp_matrix(z_size, d)
            wc = _linear_interp_matrix(c3, embed)
            out_d, out_embed = d, embed
        elif self.fit_mode == 'prune':
            out_d = min(d, z_size)
            wz = np.eye(z_size, dtype=np.float32)[:out_d]
            wc = _linear_interp_matrix(c3, embed)
            out_embed = embed
        else:
            raise NotImplementedError('Unknown positional embedding mode')

        wct = np.ascontiguousarray(wc.T)                  # (c3, out_embed)
        wct_z, wct_y, wct_x = wct[:num], wct[num:2 * num], wct[2 * num:]

        # grid-invariant z contribution, hoisted fully out of the kernel.
        # unit dim lives on the SUBLANE axis -> no 128-lane padding in VMEM.
        z_pos = np.arange(1, z_size + 1, dtype=np.float32)
        if self.normalize:
            z_pos = z_pos / (z_size + eps) * self.scale
        enc_z = np.sin(z_pos[:, None] * inv[None, :] + phase[None, :]).astype(np.float32)
        z_part = (wz @ enc_z @ wct_z).astype(np.float32).reshape(out_d, 1, out_embed)
        rowsum = wz.sum(axis=1).astype(np.float32)
        apply_rowsum = not np.allclose(rowsum, 1.0, atol=1e-6)   # always 1 for these fits
        rowsum3 = rowsum.reshape(out_d, 1, 1)

        # fused y|x channel-fit weights for one (t_hw, 2num) @ (2num, E) MXU matmul
        wyx = np.ascontiguousarray(np.concatenate([wct_y, wct_x], axis=0))   # (2num, E)

        # ---------------- tiling (generation-aware VMEM budget) -----------
        cap = _tpu_vmem_capacity_bytes()
        # per-output-buffer budget: ~28 MiB on 128 MiB parts (v5e/v6e), ~11 MiB on v7x
        budget = (28 << 20) if cap >= (96 << 20) else (11 << 20)
        out_itemsize = jnp.dtype(self.out_dtype).itemsize
        e_pad = _round_up(out_embed, _LANE)
        per_pos_bytes = out_d * e_pad * out_itemsize      # one sublane row of the out block
        t_cap = max(_LANE, (budget // (per_pos_bytes * _LANE)) * _LANE)
        hw_pad_min = _round_up(hw, _LANE)
        t_hw = int(min(2048, t_cap, hw_pad_min))          # store roofline plateaus ~1-2K lanes
        n_tiles = int(pl.cdiv(hw, t_hw))
        # ensure >= 2 spatial tiles so both v7x TensorCores get work ("parallel" axis);
        # costs ~one extra 0.35us grid step on single-TC parts -> negligible.
        if n_tiles == 1 and hw_pad_min >= 2 * _LANE:
            t_hw = ((hw_pad_min // _LANE + 1) // 2) * _LANE
            n_tiles = int(pl.cdiv(hw, t_hw))
        hw_pad = n_tiles * t_hw

        # host-precomputed angle tile: no in-kernel iota / div / mod / where.
        flat = np.arange(hw_pad, dtype=np.int64)
        y_pos = (flat // w + 1).astype(np.float32)
        x_pos = (flat % w + 1).astype(np.float32)
        if self.normalize:
            y_pos = y_pos / (h + eps) * self.scale
            x_pos = x_pos / (w + eps) * self.scale
        ang = np.empty((hw_pad, two_num), dtype=np.float32)
        ang[:, :num] = y_pos[:, None] * inv[None, :] + phase[None, :]
        ang[:, num:] = x_pos[:, None] * inv[None, :] + phase[None, :]

        # ---------------- VMEM accounting / compiler params ----------------
        out_block = out_d * t_hw * e_pad * out_itemsize
        ang_block = t_hw * _round_up(two_num, _LANE) * 4
        wyx_block = _round_up(two_num, 8) * e_pad * 4
        zpart_block = out_d * 8 * e_pad * 4
        rowsum_block = out_d * 8 * _LANE * 4
        total = 2 * (out_block + ang_block + wyx_block + zpart_block + rowsum_block)
        vmem_limit = int(min(max(total + (6 << 20), 16 << 20), int(cap * 0.9)))

        kernel = functools.partial(_pe3d_kernel, apply_rowsum=apply_rowsum)

        pallas_fn = pl.pallas_call(
            kernel,
            out_shape=jax.ShapeDtypeStruct((out_d, hw_pad, out_embed), self.out_dtype),
            grid=(n_tiles,),
            in_specs=[
                pl.BlockSpec((t_hw, two_num), lambda i: (i, 0)),            # angle tile
                pl.BlockSpec((two_num, out_embed), lambda i: (0, 0)),       # fused y|x weights
                pl.BlockSpec((out_d, 1, out_embed), lambda i: (0, 0, 0)),   # hoisted z part
                pl.BlockSpec((out_d, 1, 1), lambda i: (0, 0, 0)),           # Wz row sums
            ],
            out_specs=pl.BlockSpec((out_d, t_hw, out_embed), lambda i: (0, i, 0)),
            compiler_params=pltpu.CompilerParams(
                dimension_semantics=("parallel",),
                vmem_limit_bytes=vmem_limit),
        )

        def run(ang_d, wyx_d, zpart_d, rowsum_d):
            out = pallas_fn(ang_d, wyx_d, zpart_d, rowsum_d)   # (out_d, hw_pad, E), channels-last
            if hw_pad != hw:
                out = out[:, :hw, :]                           # drop tail-tile lane padding
            if needs_fit:
                out = out.reshape(out_d, h, w, out_embed)
            # else: PyTorch returns the un-reshaped (z_size, h*w, 3*num) tensor.
            return out

        fn = jax.jit(run)
        args = (jnp.asarray(ang), jnp.asarray(wyx),
                jnp.asarray(z_part), jnp.asarray(rowsum3))
        return fn, args


# ----------------------------------------------------------------------------
# Pure-JAX reference (mirrors the PyTorch forward) for validation
# ----------------------------------------------------------------------------
def _reference(scan_shape, z_size, temperature, normalize, scale, fit_mode):
    d, embed, h, w = scan_shape
    half = embed // 3
    num = half + half % 2
    c3 = 3 * num
    eps = 1e-6
    z = jnp.arange(1, z_size + 1, dtype=jnp.float32)
    y = jnp.arange(1, h + 1, dtype=jnp.float32)
    x = jnp.arange(1, w + 1, dtype=jnp.float32)
    if normalize:
        z = z / (z_size + eps) * scale
        y = y / (h + eps) * scale
        x = x / (w + eps) * scale
    dim_t = jnp.asarray(_dim_t(embed, temperature))

    def interleave(p):
        a = p[:, None] / dim_t
        s = jnp.sin(a[:, 0::2])
        c = jnp.cos(a[:, 1::2])
        return jnp.stack([s, c], axis=-1).reshape(p.shape[0], num)

    pz = jnp.broadcast_to(interleave(z)[:, None, None, :], (z_size, h, w, num))
    py = jnp.broadcast_to(interleave(y)[None, :, None, :], (z_size, h, w, num))
    px = jnp.broadcast_to(interleave(x)[None, None, :, :], (z_size, h, w, num))
    pos = jnp.concatenate([pz, py, px], axis=-1).reshape(z_size, h * w, c3)

    if c3 != embed or z_size != d:
        if fit_mode == 'interpolate':
            wz = jnp.asarray(_linear_interp_matrix(z_size, d))
            wc = jnp.asarray(_linear_interp_matrix(c3, embed))
            pos = jnp.einsum('dz,zpc,ec->dpe', wz, pos, wc)
            return pos.reshape(d, h, w, embed)
        if fit_mode == 'prune':
            wc = jnp.asarray(_linear_interp_matrix(c3, embed))
            pos = jnp.einsum('zpc,ec->zpe', pos, wc).reshape(z_size, h, w, embed)
            return pos[:min(d, z_size)]
    return pos


if __name__ == "__main__":
    key = jax.random.PRNGKey(0)

    # (d, embed, h, w, z_size, fit_mode, normalize)
    configs = [
        (6, 32, 16, 16,  8, 'interpolate', False),   # primary case, hw % 128 == 0 (2 tiles)
        (5, 64,  9, 11, 12, 'interpolate', True),    # normalize + padded tail tile
        (4, 50,  8, 10, 10, 'prune',       False),   # prune path, hw < 128
        (4, 48,  8, 16,  4, 'interpolate', False),   # no-fit path (c3 == embed, d == z_size)
    ]

    for (d, embed, h, w, z_size, fit_mode, normalize) in configs:
        # scan is only used for its shape (as in the PyTorch module)
        scan = jax.random.normal(key, (d, embed, h, w), dtype=jnp.float32)
        module = PositionalEncodingSine3D(embed_size=embed, z_size=z_size,
                                          fit_mode=fit_mode, temperature=10000,
                                          normalize=normalize)
        pos = jax.block_until_ready(module(scan))
        # second call exercises the per-shape weight / compile cache
        pos2 = jax.block_until_ready(module(scan))
        ref = _reference((d, embed, h, w), z_size=z_size, temperature=10000,
                         normalize=normalize, scale=2 * math.pi, fit_mode=fit_mode)
        assert pos.shape == ref.shape, (pos.shape, ref.shape)
        np.testing.assert_allclose(np.asarray(pos), np.asarray(ref), atol=2e-3, rtol=0)
        np.testing.assert_allclose(np.asarray(pos2), np.asarray(pos), atol=0, rtol=0)

    print("KERNEL_OK")
</pallas_src>

<mosaic_0001>
module attributes {stable_mosaic.version = 11 : i64} {
  func.func @_pe3d_kernel(%arg0: i32, %arg1: memref<128x20xf32, #tpu.memory_space<vmem>>, %arg2: memref<20x32xf32, #tpu.memory_space<vmem>>, %arg3: memref<6x1x32xf32, #tpu.memory_space<vmem>>, %arg4: memref<6x1x1xf32, #tpu.memory_space<vmem>>, %arg5: memref<6x128x32xf32, #tpu.memory_space<vmem>>) attributes {dimension_semantics = [#tpu.dimension_semantics<parallel>], iteration_bounds = array<i64: 2>, scalar_prefetch = 0 : i64, scratch_operands = 0 : i64, tpu.core_type = #tpu.core_type<tc>, window_params = [{transform_indices = @transform_0, window_bounds = array<i64: 128, 20>}, {pipeline_mode = #tpu.pipeline_mode<synchronous>, transform_indices = @transform_1, window_bounds = array<i64: 20, 32>}, {pipeline_mode = #tpu.pipeline_mode<synchronous>, transform_indices = @transform_2, window_bounds = array<i64: 6, 1, 32>}, {pipeline_mode = #tpu.pipeline_mode<synchronous>, transform_indices = @transform_3, window_bounds = array<i64: 6, 1, 1>}, {transform_indices = @transform_4, window_bounds = array<i64: 6, 128, 32>}]} {
    %c0 = arith.constant 0 : index
    %c0_0 = arith.constant 0 : index
    %0 = vector.load %arg1[%c0, %c0_0] : memref<128x20xf32, #tpu.memory_space<vmem>>, vector<128x20xf32>
    %1 = math.sin %0 : vector<128x20xf32>
    %c0_1 = arith.constant 0 : index
    %c0_2 = arith.constant 0 : index
    %2 = vector.load %arg2[%c0_1, %c0_2] : memref<20x32xf32, #tpu.memory_space<vmem>>, vector<20x32xf32>
    %cst = arith.constant dense<0.000000e+00> : vector<128x32xf32>
    %3 = tpu.matmul %1, %2, %cst {dimension_numbers = #tpu.dot_dimension_numbers<[1], [0], [0], [1], [0, 0, 1, 1], [], []>} : vector<128x20xf32>, vector<20x32xf32>, vector<128x32xf32> -> vector<128x32xf32>
    %4 = vector.shape_cast %3 : vector<128x32xf32> to vector<1x128x32xf32>
    %c0_3 = arith.constant 0 : index
    %c0_4 = arith.constant 0 : index
    %c0_5 = arith.constant 0 : index
    %5 = vector.load %arg3[%c0_3, %c0_4, %c0_5] : memref<6x1x32xf32, #tpu.memory_space<vmem>>, vector<6x1x32xf32>
    %6 = vector.broadcast %5 : vector<6x1x32xf32> to vector<6x128x32xf32>
    %7 = vector.broadcast %4 : vector<1x128x32xf32> to vector<6x128x32xf32>
    %8 = arith.addf %6, %7 : vector<6x128x32xf32>
    %c0_6 = arith.constant 0 : index
    %c0_7 = arith.constant 0 : index
    %c0_8 = arith.constant 0 : index
    %9 = vector.load %arg5[%c0_6, %c0_7, %c0_8] : memref<6x128x32xf32, #tpu.memory_space<vmem>>, vector<6x128x32xf32>
    tpu.vector_store %arg5[%c0_6, %c0_7, %c0_8], %8 {strides = array<i32>} : memref<6x128x32xf32, #tpu.memory_space<vmem>>, vector<6x128x32xf32>,
    return
  }
  func.func @transform_0(%arg0: i32) -> (i32, i32) {
    %c0_i32 = arith.constant 0 : i32
    %c0_i32_0 = arith.constant 0 : i32
    return %arg0, %c0_i32 : i32, i32
  }
  func.func @transform_1(%arg0: i32) -> (i32, i32) {
    %c0_i32 = arith.constant 0 : i32
    %c0_i32_0 = arith.constant 0 : i32
    %c0_i32_1 = arith.constant 0 : i32
    return %c0_i32, %c0_i32_0 : i32, i32
  }
  func.func @transform_2(%arg0: i32) -> (i32, i32, i32) {
    %c0_i32 = arith.constant 0 : i32
    %c0_i32_0 = arith.constant 0 : i32
    %c0_i32_1 = arith.constant 0 : i32
    %c0_i32_2 = arith.constant 0 : i32
    return %c0_i32, %c0_i32_0, %c0_i32_1 : i32, i32, i32
  }
  func.func @transform_3(%arg0: i32) -> (i32, i32, i32) {
    %c0_i32 = arith.constant 0 : i32
    %c0_i32_0 = arith.constant 0 : i32
    %c0_i32_1 = arith.constant 0 : i32
    %c0_i32_2 = arith.constant 0 : i32
    return %c0_i32, %c0_i32_0, %c0_i32_1 : i32, i32, i32
  }
  func.func @transform_4(%arg0: i32) -> (i32, i32, i32) {
    %c0_i32 = arith.constant 0 : i32
    %c0_i32_0 = arith.constant 0 : i32
    %c0_i32_1 = arith.constant 0 : i32
    return %c0_i32, %arg0, %c0_i32_0 : i32, i32, i32
  }
}

</mosaic_0001>

<bundles_post_ra>
// kernel: run.1
= control target key start
LH: loop header
LB: loop body
LE: loop exit
PB: predicated region body
PF: predicated region fallthrough
CT: control target
= control target key end

     0   :  { %9 = vsyncpa [#allocation3], 0  ;;  %s4600_s0 = inlined_call_operand.vmem [shape: f32[256,20], index: 0, kind: input, shape index: {}]   ;;  %s4601_s1 = inlined_call_operand.vmem [shape: f32[20,32], index: 1, kind: input, shape index: {}]   ;;  %s4602_s2 = inlined_call_operand.vmem [shape: f32[6,1,32], index: 2, kind: input, shape index: {}]   ;;  %s4603_s3 = inlined_call_operand.vmem [shape: f32[6,1,1], index: 3, kind: input, shape index: {}]   ;;  %s4604_s4 = inlined_call_operand.hbm [shape: f32[6,256,32], index: 4, kind: output, shape index: {}]  }
   0x1   :  { %11 = vsyncpa [#allocation3 + $0x1], 0  ;;  %s2836_s15 = smov 0   ;;  %s2838_s16 = smov 0  }
   0x2   :  { %s2840_s17 = smov 0   ;;  %s2842_s18 = smov 0  }
   0x3 LB: > { %s2857_s3 = sadd.s32 4294967295, %s2796_s18   ;;  %s2420_s19 = sadd.s32 4294967294, %s2796_s18   ;;  %s2796_s18 = sphi %s2842_s18, %s4638_s18   ;;  %s2792_s17 = sphi %s2840_s17, %s4637_s17   ;;  %s2788_s16 = sphi %s2838_s16, %s4636_s16   ;;  %s2784_s15 = sphi %s2836_s15, %s4635_s15  }
   0x4   : > { %s2861_s20 = sadd.s32 1, %s2796_s18   ;;  %s113_s21 = sadd.s32 1, %s2792_s17 }
   0x5   : > { %s110_s22 = ssub.s32 %s2796_s18, %s2861_s20  ;;  %p123_p0 = scmp.ne.s32.totalorder %s2792_s17, %s2788_s16 }
   0x6   : > { %p111_p1 = scmp.eq.s32.totalorder %s110_s22, 0  ;;  %p124_p2 = scmp.eq.s32.totalorder %s2857_s3, 1 }
   0x7   : > { %p129_p3 = scmp.ne.s32.totalorder %s2788_s16, %s2784_s15  ;;  %p130_p4 = scmp.eq.s32.totalorder %s2420_s19, 1 }
   0x8   : > { %s2872_s23 = scalar_select %p111_p1, %s2792_s17, %s113_s21  }
   0x9   : > { %p2874_p5 = por %p124_p2, %p123_p0  ;;  %p2878_p6 = por %p130_p4, %p129_p3 }
   0xa   : > { %p2423_p7 = scmp.ge.s32.totalorder %s2796_s18, 1  ;;  %p166_p8 = scmp.lt.s32.totalorder %s2796_s18, 3 }
   0xc   : > { %p167_p9 = pnand %p2423_p7, %p166_p8 }
   0xd   : > { %v1879_v0 = vld [vmem:[%s4601_s1] sm:$0xff] (!%p167_p9)  ;;  %v1880_v1 = vld [vmem:[%s4601_s1 + $0x8] sm:$0xff] (!%p167_p9)  ;;  %s2424_s30 = sshll.u32 (!%p167_p9), %s2857_s3, 4  ;;  %v1881_v3 = vld [vmem:[%s4601_s1 + $0x10] sm:$0xf] (!%p167_p9)  ;;  %vm1931_vm0 = vcmask (!%p167_p9), 1043456  }
   0xe   : > { %170 = sbr.rel (%p167_p9) target bundleno = 689 (0x2b1), region = 36  ;;  %v2567_v2 = vpack.c.bf16 (!%p167_p9), %v1880_v1, %v1879_v0  ;;  %p193_p10 = scmp.lt.s32.totalorder (!%p167_p9), %s2424_s30, 31  ;;  %v2798_v35 = vmov (!%p167_p9), 683565275   ;;  %v2799_v37 = vmov (!%p167_p9), 2475754826  }
   0xf   : > { %v2800_v39 = vmov (!%p167_p9), 2131351028   ;;  %v2801_v41 = vmov (!%p167_p9), 2102212464   ;;  %v2802_v43 = vmov (!%p167_p9), 920167782  }
  0x10   : > { %2568 = vmatprep.subr.bf16.mxu0 (!%p167_p9), %v2567_v2  ;;  %2571 = vmatprep.subr.bf16.mxu1 (!%p167_p9), %v2567_v2  ;;  %v2803_v51 = vmov (!%p167_p9), 1326507024   ;;  %s189_s11 = sand.u32 (!%p167_p9), 1, %s2788_s16  }
  0x11   : > { %2570 = vmatpush3.bf16.msra.mxu0 (!%p167_p9), %v2567_v2  ;;  %2573 = vmatpush3.bf16.msra.mxu1 (!%p167_p9), %v2567_v2  ;;  %s2575_s28 = smul.u32 (!%p167_p9), 768, %s189_s11  ;;  %s2316_s8 = scalar_lea.sflag (!%p167_p9), [#allocation3], %s189_s11 }
  0x12   : > { %2541 = vmatprep.subr.msk.mxu0 (!%p167_p9), %vm1931_vm0, %v1881_v3  ;;  %2572 = vmatprep.subr.msk.mxu1 (!%p167_p9), %vm1931_vm0, %v1881_v3 }
  0x15   : > { %s4640_s30 = smov (!%p193_p10, %s2424_s30), 31  ;;  %2542 = vmatpush3.msk.msra.mxu0 %vm1931_vm0, %v1881_v3  ;;  %2574 = vmatpush3.msk.msra.mxu1 %vm1931_vm0, %v1881_v3 }
  0x16   : > { %s2425_s7 = sshll.u32 %s4640_s30, 3 }
  0x17   : > { %s2897_s10 = scalar_lea.vmem %s4600_s0, %s2425_s7  ;;  %s4228_s7 = scalar_lea.vmem [#allocation2], %s2575_s28 }
  0x18   : > { %v2900_v4 = vld [vmem:[%s2897_s10] sm:$0xff]  ;;  %v2908_v8 = vld [vmem:[%s2897_s10 + $0x8] sm:$0xff] }
  0x19   : > { %v2903_v5 = vld [vmem:[%s2897_s10 + $0x40] sm:$0xff]  ;;  %v215_v6 = vand.u32 2147483647, %v2900_v4  ;;  %v218_v7 = vand.u32 2139095040, %v2900_v4  ;;  %v322_v15 = vand.u32 2139095040, %v2908_v8  ;;  %vm217_vm13 = vcmp.lt.s32.totalorder %v2900_v4, 0 }
  0x1a   : > { %v1047_v9 = vand.u32 2147483647, %v2903_v5  ;;  %v1050_v10 = vand.u32 2139095040, %v2903_v5  ;;  %v319_v23 = vand.u32 2147483647, %v2908_v8 }
  0x1b   : > { %v219_v11 = vshrl.u32 %v218_v7, 23  ;;  %v222_v12 = vand.u32 8388607, %v215_v6  ;;  %v323_v18 = vshrl.u32 %v322_v15, 23  ;;  %vm3014_vm15 = vcmp.le.f32.partialorder %v215_v6, 0.7853982 }
  0x1c   : > { %v1051_v13 = vshrl.u32 %v1050_v10, 23  ;;  %v1054_v14 = vand.u32 8388607, %v1047_v9  ;;  %v2924_v32 = vand.u32 8388607, %v319_v23 }
  0x1d   : > { %v2426_v16 = vadd.s32 4294967169, %v219_v11  ;;  %v223_v19 = vor.u32 8388608, %v222_v12  ;;  %v2430_v24 = vadd.s32 4294967169, %v323_v18 }
  0x1e   : > { %v2458_v17 = vadd.s32 4294967169, %v1051_v13  ;;  %v1055_v21 = vor.u32 8388608, %v1054_v14 }
  0x1f   : > { %v225_v20 = vadd.s32 1, %v2426_v16  ;;  %v2918_v28 = vshll.u32 %v223_v19, 8  ;;  %v2926_v33 = vadd.s32 1, %v2430_v24 }
  0x20   : > { %v1057_v22 = vadd.s32 1, %v2458_v17  ;;  %v2920_v31 = vshll.u32 %v1055_v21, 8 }
  0x21   : > { %vm226_vm1 = vcmp.gt.s32.totalorder %v225_v20, 0  ;;  %vm330_vm7 = vcmp.gt.s32.totalorder %v2926_v33, 0 }
  0x22   : > { %v227_v25 = vsel %vm226_vm1, %v225_v20, 0  ;;  %vm1058_vm2 = vcmp.gt.s32.totalorder %v1057_v22, 0 }
  0x23   : > { %v228_v26 = vshrl.u32 %v227_v25, 5  ;;  %v229_v27 = vand.u32 31, %v227_v25  ;;  %v1059_v29 = vsel %vm1058_vm2, %v1057_v22, 0 }
  0x24   : > { %v1061_v30 = vand.u32 31, %v1059_v29  ;;  %v2933_v45 = vshrl.u32 %v1059_v29, 5 }
  0x25   : > { %v230_v34 = vsub.s32 32, %v229_v27  ;;  %v232_v36 = vshll.u32 %v2798_v35, %v229_v27  ;;  %v235_v38 = vshll.u32 %v2799_v37, %v229_v27  ;;  %v238_v40 = vshll.u32 %v2800_v39, %v229_v27 }
  0x26   : > { %v241_v42 = vshll.u32 %v2801_v41, %v229_v27  ;;  %v244_v44 = vshll.u32 %v2802_v43, %v229_v27  ;;  %vm247_vm3 = vcmp.lt.s32.totalorder %v228_v26, 1  ;;  %vm248_vm4 = vcmp.lt.s32.totalorder %v228_v26, 2 }
  0x27   : > { %v231_v46 = vshrl.u32 %v2798_v35, %v230_v34  ;;  %v233_v47 = vshrl.u32 %v2799_v37, %v230_v34  ;;  %v236_v48 = vshrl.u32 %v2800_v39, %v230_v34  ;;  %v239_v49 = vshrl.u32 %v2801_v41, %v230_v34 }
  0x28   : > { %v242_v50 = vshrl.u32 %v2802_v43, %v230_v34  ;;  %v245_v52 = vshrl.u32 %v2803_v51, %v230_v34  ;;  %vm250_vm5 = vcmp.lt.s32.totalorder %v228_v26, 4  ;;  %v1062_v56 = vsub.s32 32, %v1061_v30 }
  0x29   : > { %v234_v53 = vor.u32 %v233_v47, %v232_v36  ;;  %v237_v54 = vor.u32 %v236_v48, %v235_v38  ;;  %v240_v55 = vor.u32 %v239_v49, %v238_v40  ;;  %vm249_vm6 = vcmp.lt.s32.totalorder %v228_v26, 3 }
  0x2a   : > { %v243_v57 = vor.u32 %v242_v50, %v241_v42  ;;  %v246_v58 = vor.u32 %v245_v52, %v244_v44  ;;  %v1064_v59 = vshll.u32 %v2798_v35, %v1061_v30  ;;  %v1067_v3 = vshll.u32 %v2799_v37, %v1061_v30 }
  0x2b   : > { %v251_v60 = vsel %vm247_vm3, %v231_v46, %v234_v53  ;;  %v252_v61 = vsel %vm250_vm5, %v240_v55, 2102212464  ;;  %v255_v62 = vsel %vm247_vm3, %v234_v53, %v237_v54  ;;  %v259_v63 = vsel %vm247_vm3, %v237_v54, %v240_v55 }
  0x2c   : > { %v253_v0 = vsel %vm249_vm6, %v237_v54, %v252_v61  ;;  %v256_v1 = vsel %vm250_vm5, %v243_v57, 920167782  ;;  %v260_v2 = vsel %vm250_vm5, %v246_v58, 1326507024  ;;  %v1063_v11 = vshrl.u32 %v2798_v35, %v1062_v56 }
  0x2d   : > { %v257_v7 = vsel %vm249_vm6, %v240_v55, %v256_v1  ;;  %v261_v10 = vsel %vm249_vm6, %v243_v57, %v260_v2  ;;  %v1065_v12 = vshrl.u32 %v2799_v37, %v1062_v56  ;;  %v254_v13 = vsel %vm248_vm4, %v251_v60, %v253_v0 }
  0x2e   : > { %v258_v14 = vsel %vm248_vm4, %v255_v62, %v257_v7  ;;  %v262_v15 = vsel %vm248_vm4, %v259_v63, %v261_v10  ;;  %v1068_v16 = vshrl.u32 %v2800_v39, %v1062_v56  ;;  %v1070_v24 = vshll.u32 %v2800_v39, %v1061_v30  ;;  %v2992_v63 = vld [vmem:[%s2897_s10 + $0x48] sm:$0xff] }
  0x2f   : > { %v2954_v17 = vmul.u32.u64.low %v2918_v28, %v262_v15  ;;  %v2955_v18 = vmul.u32.u64.high %v2918_v28, %v262_v15, %v2954_v17  ;;  %v2958_v19 = vmul.u32.u64.low %v2918_v28, %v258_v14  ;;  %v2959_v20 = vmul.u32.u64.high %v2918_v28, %v258_v14, %v2958_v19 }
  0x30   : > { %v1066_v21 = vor.u32 %v1065_v12, %v1064_v59  ;;  %v1069_v22 = vor.u32 %v1068_v16, %v1067_v3  ;;  %v1071_v25 = vshrl.u32 %v2801_v41, %v1062_v56  ;;  %v1073_v26 = vshll.u32 %v2801_v41, %v1061_v30 }
  0x31   : > { %v1074_v27 = vshrl.u32 %v2802_v43, %v1062_v56  ;;  %v1076_v29 = vshll.u32 %v2802_v43, %v1061_v30  ;;  %v1077_v34 = vshrl.u32 %v2803_v51, %v1062_v56  ;;  %v270_v36 = vmul.u32 %v2918_v28, %v254_v13 }
  0x32   : > { %v1072_v38 = vor.u32 %v1071_v25, %v1070_v24  ;;  %vm1079_vm8 = vcmp.lt.s32.totalorder %v2933_v45, 1  ;;  %vm1080_vm9 = vcmp.lt.s32.totalorder %v2933_v45, 2  ;;  %vm272_vm10 = vc.u32 %v2955_v18, %v2958_v19 }
  0x33   : > { %v273_v40 = vadd.s32 1, %v2959_v20  ;;  %v1075_v42 = vor.u32 %v1074_v27, %v1073_v26  ;;  %vm1081_vm11 = vcmp.lt.s32.totalorder %v2933_v45, 3  ;;  %v1078_v44 = vor.u32 %v1077_v34, %v1076_v29 }
  0x34   : > { %vm1082_vm12 = vcmp.lt.s32.totalorder %v2933_v45, 4  ;;  %v1083_v30 = vsel %vm1079_vm8, %v1063_v11, %v1066_v21  ;;  %v1087_v46 = vsel %vm1079_vm8, %v1066_v21, %v1069_v22  ;;  %v1091_v49 = vsel %vm1079_vm8, %v1069_v22, %v1072_v38 }
  0x35   : > { %v274_v28 = vsel %vm272_vm10, %v273_v40, %v2959_v20  ;;  %v1084_v47 = vsel %vm1082_vm12, %v1072_v38, 2102212464  ;;  %v1088_v48 = vsel %vm1082_vm12, %v1075_v42, 920167782  ;;  %v1092_v54 = vsel %vm1082_vm12, %v1078_v44, 1326507024 }
  0x36   : > { %v275_v50 = vadd.s32 %v274_v28, %v270_v36  ;;  %v1085_v52 = vsel %vm1081_vm11, %v1069_v22, %v1084_v47  ;;  %v1089_v53 = vsel %vm1081_vm11, %v1072_v38, %v1088_v48  ;;  %v1093_v57 = vsel %vm1081_vm11, %v1075_v42, %v1092_v54 }
  0x37   : > { %v1086_v55 = vsel %vm1080_vm9, %v1083_v30, %v1085_v52  ;;  %v1090_v56 = vsel %vm1080_vm9, %v1087_v46, %v1089_v53  ;;  %v331_v58 = vsel %vm330_vm7, %v2926_v33, 0  ;;  %v1094_v60 = vsel %vm1080_vm9, %v1091_v49, %v1093_v57 }
  0x38   : > { %v276_v59 = vadd.s32 536870912, %v275_v50  ;;  %v2987_v61 = vmul.u32.u64.low %v2920_v31, %v1090_v56  ;;  %v2988_v62 = vmul.u32.u64.high %v2920_v31, %v1090_v56, %v2987_v61  ;;  %v327_v2 = vor.u32 8388608, %v2924_v32 }
  0x39   : > { %v2995_v0 = vmul.u32.u64.low %v2920_v31, %v1094_v60  ;;  %v2996_v1 = vmul.u32.u64.high %v2920_v31, %v1094_v60, %v2995_v0  ;;  %v1151_v3 = vand.u32 2147483647, %v2992_v63  ;;  %v333_v7 = vand.u32 31, %v331_v58 }
  0x3a   : > { %v277_v33 = vshrl.u32 %v276_v59, 30  ;;  %v1102_v45 = vmul.u32 %v2920_v31, %v1086_v55  ;;  %v1105_v11 = vadd.s32 1, %v2988_v62  ;;  %v3005_v13 = vshll.u32 %v327_v2, 8 }
  0x3b   : > { %v334_v12 = vsub.s32 32, %v333_v7  ;;  %vm1104_vm14 = vc.u32 %v2996_v1, %v2987_v61  ;;  %v1154_v14 = vand.u32 2139095040, %v2992_v63  ;;  %v3010_v32 = vand.u32 8388607, %v1151_v3 }
  0x3c   : > { %v278_v10 = vshll.u32 %v277_v33, 30  ;;  %v301_v16 = vsub.s32 4, %v277_v33  ;;  %v1106_v17 = vsel %vm1104_vm14, %v1105_v11, %v2988_v62  ;;  %v332_v20 = vshrl.u32 %v331_v58, 5 }
  0x3d   : > { %v1107_v21 = vadd.s32 %v1106_v17, %v1102_v45  ;;  %v336_v22 = vshll.u32 %v2798_v35, %v333_v7  ;;  %v337_v24 = vshrl.u32 %v2799_v37, %v334_v12  ;;  %v339_v25 = vshll.u32 %v2799_v37, %v333_v7 }
  0x3e   : > { %v3018_v15 = vsub.s32 %v275_v50, %v278_v10  ;;  %v340_v6 = vshrl.u32 %v2800_v39, %v334_v12  ;;  %v342_v27 = vshll.u32 %v2800_v39, %v333_v7  ;;  %v343_v29 = vshrl.u32 %v2801_v41, %v334_v12 }
  0x3f   : > { %v271_v34 = vadd.s32 %v2958_v19, %v2955_v18  ;;  %v1108_v36 = vadd.s32 536870912, %v1107_v21  ;;  %v345_v38 = vshll.u32 %v2801_v41, %v333_v7  ;;  %v1155_v40 = vshrl.u32 %v1154_v14, 23 }
  0x40   : > { %v281_v26 = vsub.s32 0, %v3018_v15  ;;  %v302_v44 = vsel %vm217_vm13, %v301_v16, %v277_v33  ;;  %v346_v30 = vshrl.u32 %v2802_v43, %v334_v12  ;;  %vm354_vm0 = vcmp.lt.s32.totalorder %v332_v20, 4 }
  0x41   : > { %v3035_v46 = vshrl.u32 %v1108_v36, 30  ;;  %v335_v28 = vshrl.u32 %v2798_v35, %v334_v12  ;;  %v348_v47 = vshll.u32 %v2802_v43, %v333_v7  ;;  %v349_v18 = vshrl.u32 %v2803_v51, %v334_v12 }
  0x42   : > { %v2427_v42 = vmin.u32 %v281_v26, %v3018_v15  ;;  %v338_v48 = vor.u32 %v337_v24, %v336_v22  ;;  %v341_v49 = vor.u32 %v340_v6, %v339_v25  ;;  %v344_v50 = vor.u32 %v343_v29, %v342_v27 }
  0x43   : > { %v1110_v52 = vshll.u32 %v3035_v46, 30  ;;  %v347_v53 = vor.u32 %v346_v30, %v345_v38  ;;  %vm351_vm1 = vcmp.lt.s32.totalorder %v332_v20, 1  ;;  %vm353_vm2 = vcmp.lt.s32.totalorder %v332_v20, 3 }
  0x44   : > { %v283_v19 = vclz %v2427_v42  ;;  %v350_v55 = vor.u32 %v349_v18, %v348_v47  ;;  %v356_v56 = vsel %vm354_vm0, %v344_v50, 2102212464  ;;  %v2462_v57 = vadd.s32 4294967169, %v1155_v40 }
  0x45   : > { %v304_v58 = vsel %vm3014_vm15, 0, %v302_v44  ;;  %v3044_v59 = vsub.s32 %v1107_v21, %v1110_v52  ;;  %vm352_vm3 = vcmp.lt.s32.totalorder %v332_v20, 2  ;;  %v360_v60 = vsel %vm354_vm0, %v347_v53, 920167782 }
  0x46   : > { %v2428_v54 = vadd.s32 4294967294, %v283_v19  ;;  %v355_v62 = vsel %vm351_vm1, %v335_v28, %v338_v48  ;;  %v359_v0 = vsel %vm351_vm1, %v338_v48, %v341_v49  ;;  %v361_v2 = vsel %vm353_vm2, %v344_v50, %v360_v60 }
  0x47   : > { %v1113_v7 = vsub.s32 0, %v3044_v59  ;;  %v357_v45 = vsel %vm353_vm2, %v341_v49, %v356_v56  ;;  %v363_v10 = vsel %vm351_vm1, %v341_v49, %v344_v50  ;;  %v364_v16 = vsel %vm354_vm0, %v350_v55, 1326507024 }
  0x48   : > { %vm2429_vm4 = vcmp.lt.s32.totalorder %v2428_v54, 0  ;;  %vm1049_vm5 = vcmp.lt.s32.totalorder %v2903_v5, 0  ;;  %v362_v21 = vsel %vm352_vm3, %v359_v0, %v361_v2  ;;  %v365_v22 = vsel %vm353_vm2, %v347_v53, %v364_v16 }
  0x49   : > { %v286_v33 = vsel %vm2429_vm4, 0, %v2428_v54  ;;  %v2459_v17 = vmin.u32 %v1113_v7, %v3044_v59  ;;  %v366_v26 = vsel %vm352_vm3, %v363_v10, %v365_v22  ;;  %v1161_v6 = vadd.s32 1, %v2462_v57 }
  0x4a   : > { %v287_v11 = vsub.s32 32, %v286_v33  ;;  %v288_v12 = vshll.u32 %v3018_v15, %v286_v33  ;;  %v291_v14 = vsub.s32 4294967266, %v286_v33  ;;  %v308_v27 = vadd.s32 3, %v304_v58 }
  0x4b   : > { %v1115_v29 = vclz %v2459_v17  ;;  %v358_v15 = vsel %vm352_vm3, %v355_v62, %v357_v45  ;;  %v1159_v36 = vor.u32 8388608, %v3010_v32  ;;  %vm1162_vm6 = vcmp.gt.s32.totalorder %v1161_v6, 0 }
  0x4c   : > { %v289_v24 = vshrl.u32 %v271_v34, %v287_v11  ;;  %v292_v25 = vadd.s32 127, %v291_v14  ;;  %v3063_v42 = vmul.u32.u64.low %v3005_v13, %v366_v26  ;;  %v3064_v44 = vmul.u32.u64.high %v3005_v13, %v366_v26, %v3063_v42 }
  0x4d   : > { %v2460_v30 = vadd.s32 4294967294, %v1115_v29  ;;  %v3067_v28 = vmul.u32.u64.low %v3005_v13, %v362_v21  ;;  %v3068_v34 = vmul.u32.u64.high %v3005_v13, %v362_v21, %v3067_v28  ;;  %v1133_v20 = vsub.s32 4, %v3035_v46 }
  0x4e   : > { %v290_v38 = vor.u32 %v289_v24, %v288_v12  ;;  %v293_v40 = vshll.u32 %v292_v25, 23  ;;  %v1163_v19 = vsel %vm1162_vm6, %v1161_v6, 0  ;;  %v3072_v48 = vand.u32 3, %v308_v27 }
  0x4f   : > { %v1103_v49 = vadd.s32 %v2987_v61, %v2996_v1  ;;  %vm2461_vm7 = vcmp.lt.s32.totalorder %v2460_v30, 0  ;;  %v1165_v50 = vand.u32 31, %v1163_v19  ;;  %v374_v54 = vmul.u32 %v3005_v13, %v358_v15 }
  0x50   : > { %v294_v47 = vor.u32 4788187, %v293_v40  ;;  %v297_v18 = vcvt.s32.f32 %v290_v38  ;;  %v1118_v53 = vsel %vm2461_vm7, 0, %v2460_v30  ;;  %vm376_vm8 = vc.u32 %v3064_v44, %v3067_v28 }
  0x51   : > { %vm3081_vm9 = vcmp.le.f32.partialorder %v1047_v9, 0.7853982  ;;  %v1119_v56 = vsub.s32 32, %v1118_v53  ;;  %v1120_v57 = vshll.u32 %v3044_v59, %v1118_v53  ;;  %v1123_v58 = vsub.s32 4294967266, %v1118_v53 }
  0x52   : > { %v295_v52 = vand.u32 2147483647, %v294_v47  ;;  %v377_v61 = vadd.s32 1, %v3068_v34  ;;  %v1134_v13 = vsel %vm1049_vm5, %v1133_v20, %v3035_v46  ;;  %v3090_v60 = vshrl.u32 %v1163_v19, 5 }
  0x53   : > { %v1166_v62 = vsub.s32 32, %v1165_v50  ;;  %v1121_v0 = vshrl.u32 %v1103_v49, %v1119_v56  ;;  %v1124_v2 = vadd.s32 127, %v1123_v58  ;;  %v1168_v33 = vshll.u32 %v2798_v35, %v1165_v50 }
  0x54   : > { %v298_v1 = vmul.f32 %v297_v18, %v295_v52  ;;  %v378_v9 = vsel %vm376_vm8, %v377_v61, %v3068_v34  ;;  %v1171_v10 = vshll.u32 %v2799_v37, %v1165_v50  ;;  %v1174_v46 = vshll.u32 %v2800_v39, %v1165_v50 }
  0x55   : > { %v379_v45 = vadd.s32 %v378_v9, %v374_v54  ;;  %v1169_v59 = vshrl.u32 %v2799_v37, %v1166_v62  ;;  %v1122_v11 = vor.u32 %v1121_v0, %v1120_v57  ;;  %v1125_v12 = vshll.u32 %v1124_v2, 23 }
  0x56   : > { %v299_v7 = vxor.u32 2147483648, %v298_v1  ;;  %v1172_v14 = vshrl.u32 %v2800_v39, %v1166_v62  ;;  %v1175_v21 = vshrl.u32 %v2801_v41, %v1166_v62  ;;  %v1177_v22 = vshll.u32 %v2801_v41, %v1165_v50 }
  0x57   : > { %v380_v17 = vadd.s32 536870912, %v379_v45  ;;  %v1126_v25 = vor.u32 4788187, %v1125_v12  ;;  %v1129_v26 = vcvt.s32.f32 %v1122_v11  ;;  %v1170_v6 = vor.u32 %v1169_v59, %v1168_v33 }
  0x58   : > { %v300_v16 = vsel %vm217_vm13, %v299_v7, %v298_v1  ;;  %v1173_v29 = vor.u32 %v1172_v14, %v1171_v10  ;;  %v1178_v15 = vshrl.u32 %v2802_v43, %v1166_v62  ;;  %v1180_v40 = vshll.u32 %v2802_v43, %v1165_v50 }
  0x59   : > { %v303_v24 = vsel %vm3014_vm15, %v2900_v4, %v300_v16  ;;  %v3105_v27 = vshrl.u32 %v380_v17, 30  ;;  %v1127_v38 = vand.u32 2147483647, %v1126_v25  ;;  %v1181_v42 = vshrl.u32 %v2803_v51, %v1166_v62 }
  0x5a   : > { %2698 = vcosq.f32 %v303_v24  ;;  %v1136_v30 = vsel %vm3081_vm9, 0, %v1134_v13  ;;  %v1179_v34 = vor.u32 %v1178_v15, %v1177_v22  ;;  %vm1183_vm10 = vcmp.lt.s32.totalorder %v3090_v60, 1 }
  0x5b   : > { %2700 = vsinq.f32 %v303_v24  ;;  %v382_v31 = vshll.u32 %v3105_v27, 30  ;;  %v1130_v47 = vmul.f32 %v1129_v26, %v1127_v38  ;;  %v1167_v18 = vshrl.u32 %v2798_v35, %v1166_v62  ;;  %v3175_v24 = vld [vmem:[%s2897_s10 + $0x10] sm:$0xff] }
  0x5c   : > { %v1176_v20 = vor.u32 %v1175_v21, %v1174_v46  ;;  %v3117_v19 = vshll.u32 %v1159_v36, 8  ;;  %vm310_vm11 = vcmp.lt.s32.totalorder %v3072_v48, 2  ;;  %v1182_v50 = vor.u32 %v1181_v42, %v1180_v40 }
  0x5d   : > { %v3120_v49 = vsub.s32 %v379_v45, %v382_v31  ;;  %vm1185_vm12 = vcmp.lt.s32.totalorder %v3090_v60, 3  ;;  %vm1186_vm13 = vcmp.lt.s32.totalorder %v3090_v60, 4  ;;  %vm307_vm14 = vweird.f32 %v2900_v4 }
  0x5e   : > { %v1131_v52 = vxor.u32 2147483648, %v1130_v47  ;;  %vm321_vm15 = vcmp.lt.s32.totalorder %v2908_v8, 0  ;;  %vm1184_vm0 = vcmp.lt.s32.totalorder %v3090_v60, 2  ;;  %v1188_v32 = vsel %vm1186_vm13, %v1176_v20, 2102212464 }
  0x5f   : > { %v1191_v36 = vsel %vm1183_vm10, %v1170_v6, %v1173_v29  ;;  %vm311_vm1 = vcmp.eq.s32.totalorder %v3072_v48, 0  ;;  %vm1882_vm2 = vcmask 162816   ;;  %v1140_v53 = vadd.s32 3, %v1136_v30 }
  0x60   : > { %v385_v54 = vsub.s32 0, %v3120_v49  ;;  %v1192_v56 = vsel %vm1186_vm13, %v1179_v34, 920167782  ;;  %v1132_v57 = vsel %vm1049_vm5, %v1131_v52, %v1130_v47  ;;  %v1187_v58 = vsel %vm1183_vm10, %v1167_v18, %v1170_v6 }
  0x61   : > { %v1189_v61 = vsel %vm1185_vm12, %v1173_v29, %v1188_v32  ;;  %v1193_v1 = vsel %vm1185_vm12, %v1176_v20, %v1192_v56  ;;  %v1135_v13 = vsel %vm3081_vm9, %v2903_v5, %v1132_v57  ;;  %vm3148_vm3 = vcmp.le.f32.partialorder %v319_v23, 0.7853982  ;;  %v3205_v32 = vld [vmem:[%s2897_s10 + $0x50] sm:$0xff] }
  0x62   : > { %v2431_v0 = vmin.u32 %v385_v54, %v3120_v49  ;;  %v1194_v2 = vsel %vm1184_vm0, %v1191_v36, %v1193_v1  ;;  %v1195_v9 = vsel %vm1183_vm10, %v1173_v29, %v1176_v20  ;;  %2702 = vcosq.f32 %v1135_v13 }
  0x63   : > { %v1196_v33 = vsel %vm1186_vm13, %v1182_v50, 1326507024  ;;  %v3160_v55 = vmul.u32.u64.low %v3117_v19, %v1194_v2  ;;  %v3161_v7 = vmul.u32.u64.high %v3117_v19, %v1194_v2, %v3160_v55  ;;  %vm314_vm4 = vcmp.eq.s32.totalorder %v3072_v48, 2 }
  0x64   : > { %v2699_v23 = vpop.eup %2698  ;;  %2704 = vsinq.f32 %v1135_v13  ;;  %v387_v45 = vclz %v2431_v0  ;;  %v405_v59 = vsub.s32 4, %v3105_v27  ;;  %v1141_v12 = vand.u32 3, %v1140_v53 }
  0x65   : > { %v2701_v10 = vpop.eup %2700  ;;  %v315_v11 = vxor.u32 2147483648, %v2699_v23  ;;  %v375_v14 = vadd.s32 %v3067_v28, %v3064_v44  ;;  %v1197_v46 = vsel %vm1185_vm12, %v1179_v34, %v1196_v33  ;;  %v1190_v21 = vsel %vm1184_vm0, %v1187_v58, %v1189_v61 }
  0x66   : > { %v312_v16 = vxor.u32 2147483648, %v2701_v10  ;;  %v2432_v17 = vadd.s32 4294967294, %v387_v45  ;;  %v1198_v22 = vsel %vm1184_vm0, %v1195_v9, %v1197_v46  ;;  %v423_v44 = vand.u32 2147483647, %v3175_v24 }
  0x67   : > { %v316_v25 = vsel %vm314_vm4, %v315_v11, %v2701_v10  ;;  %v3178_v26 = vmul.u32.u64.low %v3117_v19, %v1198_v22  ;;  %v3179_v6 = vmul.u32.u64.high %v3117_v19, %v1198_v22, %v3178_v26  ;;  %vm1139_vm5 = vweird.f32 %v2903_v5 }
  0x68   : > { %v313_v28 = vsel %vm311_vm1, %v2699_v23, %v312_v16  ;;  %vm2433_vm6 = vcmp.lt.s32.totalorder %v2432_v17, 0  ;;  %v406_v60 = vsel %vm321_vm15, %v405_v59, %v3105_v27  ;;  %v1209_v29 = vadd.s32 1, %v3161_v7 }
  0x69   : > { %v317_v15 = vsel %vm310_vm11, %v313_v28, %v316_v25  ;;  %v390_v38 = vsel %vm2433_vm6, 0, %v2432_v17  ;;  %v1206_v40 = vmul.u32 %v3117_v19, %v1190_v21  ;;  %v426_v42 = vand.u32 2139095040, %v3175_v24 }
  0x6a   : > { %v318_v30 = vsel %vm307_vm14, nan, %v317_v15  ;;  %v391_v31 = vsub.s32 32, %v390_v38  ;;  %v392_v34 = vshll.u32 %v3120_v49, %v390_v38  ;;  %v395_v47 = vsub.s32 4294967266, %v390_v38 }
  0x6b   : > { %2543 = vmatprep.mubr.msk.f32.mxu0 %vm1882_vm2, %v318_v30  ;;  %v408_v27 = vsel %vm3148_vm3, 0, %v406_v60  ;;  %vm1208_vm7 = vc.u32 %v3179_v6, %v3160_v55  ;;  %v427_v48 = vshrl.u32 %v426_v42, 23  ;;  %v430_v18 = vand.u32 8388607, %v423_v44 }
  0x6c   : > { %vm1142_vm8 = vcmp.lt.s32.totalorder %v1141_v12, 2  ;;  %v393_v4 = vshrl.u32 %v375_v14, %v391_v31  ;;  %v396_v20 = vadd.s32 127, %v395_v47  ;;  %v1210_v19 = vsel %vm1208_vm7, %v1209_v29, %v3161_v7  ;;  %v2703_v49 = vpop.eup %2702 }
  0x6d   : > { %vm1143_vm9 = vcmp.eq.s32.totalorder %v1141_v12, 0  ;;  %vm1146_vm10 = vcmp.eq.s32.totalorder %v1141_v12, 2  ;;  %v1211_v50 = vadd.s32 %v1210_v19, %v1206_v40  ;;  %v2434_v52 = vadd.s32 4294967169, %v427_v48 }
  0x6e   : > { %v2705_v36 = vpop.eup %2704  ;;  %v1147_v53 = vxor.u32 2147483648, %v2703_v49  ;;  %v394_v54 = vor.u32 %v393_v4, %v392_v34  ;;  %v397_v56 = vshll.u32 %v396_v20, 23  ;;  %v412_v57 = vadd.s32 3, %v408_v27 }
  0x6f   : > { %v1144_v58 = vxor.u32 2147483648, %v2705_v36  ;;  %v1212_v61 = vadd.s32 536870912, %v1211_v50  ;;  %v431_v1 = vor.u32 8388608, %v430_v18  ;;  %v433_v13 = vadd.s32 1, %v2434_v52 }
  0x70   : > { %v1148_v0 = vsel %vm1146_vm10, %v1147_v53, %v2705_v36  ;;  %v398_v2 = vor.u32 4788187, %v397_v56  ;;  %v401_v9 = vcvt.s32.f32 %v394_v54  ;;  %v1258_v33 = vand.u32 2139095040, %v3205_v32 }
  0x71   : > { %v1145_v7 = vsel %vm1143_vm9, %v2703_v49, %v1144_v58  ;;  %v1213_v23 = vshrl.u32 %v1212_v61, 30  ;;  %vm434_vm11 = vcmp.gt.s32.totalorder %v433_v13, 0  ;;  %v1255_v45 = vand.u32 2147483647, %v3205_v32 }
  0x72   : > { %v1149_v59 = vsel %vm1142_vm8, %v1145_v7, %v1148_v0  ;;  %v399_v10 = vand.u32 2147483647, %v398_v2  ;;  %v435_v11 = vsel %vm434_vm11, %v433_v13, 0  ;;  %v1259_v16 = vshrl.u32 %v1258_v33, 23 }
  0x73   : > { %v1150_v14 = vsel %vm1139_vm5, nan, %v1149_v59  ;;  %v1214_v46 = vshll.u32 %v1213_v23, 30  ;;  %v3214_v21 = vand.u32 3, %v412_v57  ;;  %vm1153_vm12 = vcmp.lt.s32.totalorder %v2992_v63, 0 }
  0x74   : > { %2555 = vmatprep.mubr.msk.f32.mxu1 %vm1882_vm2, %v1150_v14  ;;  %v402_v17 = vmul.f32 %v401_v9, %v399_v10  ;;  %v437_v22 = vand.u32 31, %v435_v11  ;;  %v1207_v25 = vadd.s32 %v3160_v55, %v3179_v6  ;;  %v3221_v26 = vshll.u32 %v431_v1, 8 }
  0x75   : > { %v3219_v12 = vsub.s32 %v1211_v50, %v1214_v46  ;;  %v3225_v5 = vand.u32 8388607, %v1255_v45  ;;  %v1237_v60 = vsub.s32 4, %v1213_v23  ;;  %v3227_v29 = vshrl.u32 %v435_v11, 5 }
  0x76   : > { %v403_v28 = vxor.u32 2147483648, %v402_v17  ;;  %v438_v15 = vsub.s32 32, %v437_v22  ;;  %v440_v40 = vshll.u32 %v2798_v35, %v437_v22  ;;  %v443_v42 = vshll.u32 %v2799_v37, %v437_v22 }
  0x77   : > { %v1217_v38 = vsub.s32 0, %v3219_v12  ;;  %v2466_v55 = vadd.s32 4294967169, %v1259_v16  ;;  %v446_v34 = vshll.u32 %v2800_v39, %v437_v22  ;;  %v1263_v18 = vor.u32 8388608, %v3225_v5 }
  0x78   : > { %v404_v6 = vsel %vm321_vm15, %v403_v28, %v402_v17  ;;  %v441_v30 = vshrl.u32 %v2799_v37, %v438_v15  ;;  %v444_v31 = vshrl.u32 %v2800_v39, %v438_v15  ;;  %v447_v48 = vshrl.u32 %v2801_v41, %v438_v15 }
  0x79   : > { %v407_v47 = vsel %vm3148_vm3, %v2908_v8, %v404_v6  ;;  %v2463_v27 = vmin.u32 %v1217_v38, %v3219_v12  ;;  %v3245_v4 = vsel %vm1153_vm12, %v1237_v60, %v1213_v23  ;;  %v439_v20 = vshrl.u32 %v2798_v35, %v438_v15 }
  0x7a   : > { %2706 = vcosq.f32 %v407_v47  ;;  %v449_v19 = vshll.u32 %v2801_v41, %v437_v22  ;;  %vm3251_vm13 = vcmp.le.f32.partialorder %v1151_v3, 0.7853982  ;;  %v442_v50 = vor.u32 %v441_v30, %v440_v40 }
  0x7b   : > { %2708 = vsinq.f32 %v407_v47  ;;  %v1219_v49 = vclz %v2463_v27  ;;  %v445_v52 = vor.u32 %v444_v31, %v443_v42  ;;  %vm418_vm14 = vcmp.eq.s32.totalorder %v3214_v21, 2 }
  0x7c   : > { %v448_v36 = vor.u32 %v447_v48, %v446_v34  ;;  %v450_v53 = vshrl.u32 %v2802_v43, %v438_v15  ;;  %v452_v54 = vshll.u32 %v2802_v43, %v437_v22  ;;  %vm455_vm15 = vcmp.lt.s32.totalorder %v3227_v29, 1 }
  0x7d   : > { %vm415_vm0 = vcmp.eq.s32.totalorder %v3214_v21, 0  ;;  %v2464_v56 = vadd.s32 4294967294, %v1219_v49  ;;  %v453_v3 = vshrl.u32 %v2803_v51, %v438_v15  ;;  %vm456_vm1 = vcmp.lt.s32.totalorder %v3227_v29, 2 }
  0x7e   : > { %vm458_vm3 = vcmp.lt.s32.totalorder %v3227_v29, 4  ;;  %vm414_vm4 = vcmp.lt.s32.totalorder %v3214_v21, 2  ;;  %v451_v57 = vor.u32 %v450_v53, %v449_v19  ;;  %vm457_vm5 = vcmp.lt.s32.totalorder %v3227_v29, 3 }
  0x7f   : > { %v459_v58 = vsel %vm455_vm15, %v439_v20, %v442_v50  ;;  %v460_v61 = vsel %vm458_vm3, %v448_v36, 2102212464  ;;  %vm411_vm6 = vweird.f32 %v2908_v8  ;;  %vm2465_vm7 = vcmp.lt.s32.totalorder %v2464_v56, 0 }
  0x80   : > { %v454_v1 = vor.u32 %v453_v3, %v452_v54  ;;  %v461_v13 = vsel %vm457_vm5, %v445_v52, %v460_v61  ;;  %v463_v0 = vsel %vm455_vm15, %v442_v50, %v445_v52  ;;  %v1222_v2 = vsel %vm2465_vm7, 0, %v2464_v56 }
  0x81   : > { %v464_v9 = vsel %vm458_vm3, %v451_v57, 920167782  ;;  %v467_v33 = vsel %vm455_vm15, %v445_v52, %v448_v36  ;;  %v1265_v7 = vadd.s32 1, %v2466_v55  ;;  %v1223_v23 = vsub.s32 32, %v1222_v2 }
  0x82   : > { %v1224_v59 = vshll.u32 %v3219_v12, %v1222_v2  ;;  %v1227_v10 = vsub.s32 4294967266, %v1222_v2  ;;  %v465_v11 = vsel %vm457_vm5, %v448_v36, %v464_v9  ;;  %v462_v14 = vsel %vm456_vm1, %v459_v58, %v461_v13 }
  0x83   : > { %v466_v46 = vsel %vm456_vm1, %v463_v0, %v465_v11  ;;  %v468_v16 = vsel %vm458_vm3, %v454_v1, 1326507024  ;;  %vm1266_vm8 = vcmp.gt.s32.totalorder %v1265_v7, 0  ;;  %v1225_v17 = vshrl.u32 %v1207_v25, %v1223_v23 }
  0x84   : > { %v1228_v22 = vadd.s32 127, %v1227_v10  ;;  %v469_v28 = vsel %vm457_vm5, %v451_v57, %v468_v16  ;;  %v1267_v12 = vsel %vm1266_vm8, %v1265_v7, 0  ;;  %v2707_v60 = vpop.eup %2706  ;;  %v1240_v15 = vsel %vm3251_vm13, 0, %v3245_v4 }
  0x85   : > { %v470_v38 = vsel %vm456_vm1, %v467_v33, %v469_v28  ;;  %v3295_v40 = vmul.u32.u64.low %v3221_v26, %v466_v46  ;;  %v3296_v42 = vmul.u32.u64.high %v3221_v26, %v466_v46, %v3295_v40  ;;  %v2709_v55 = vpop.eup %2708  ;;  %v419_v25 = vxor.u32 2147483648, %v2707_v60 }
  0x86   : > { %v1226_v6 = vor.u32 %v1225_v17, %v1224_v59  ;;  %v1229_v30 = vshll.u32 %v1228_v22, 23  ;;  %v1269_v31 = vand.u32 31, %v1267_v12  ;;  %v416_v34 = vxor.u32 2147483648, %v2709_v55 }
  0x87   : > { %v3300_v47 = vmul.u32.u64.low %v3221_v26, %v470_v38  ;;  %v3301_v27 = vmul.u32.u64.high %v3221_v26, %v470_v38, %v3300_v47  ;;  %v478_v48 = vmul.u32 %v3221_v26, %v462_v14  ;;  %v420_v29 = vsel %vm418_vm14, %v419_v25, %v2709_v55 }
  0x88   : > { %v1230_v4 = vor.u32 4788187, %v1229_v30  ;;  %v1233_v20 = vcvt.s32.f32 %v1226_v6  ;;  %v1270_v19 = vsub.s32 32, %v1269_v31  ;;  %v417_v49 = vsel %vm415_vm0, %v2707_v60, %v416_v34 }
  0x89   : > { %v481_v50 = vadd.s32 1, %v3296_v42  ;;  %v1272_v52 = vshll.u32 %v2798_v35, %v1269_v31  ;;  %v1275_v36 = vshll.u32 %v2799_v37, %v1269_v31  ;;  %v421_v53 = vsel %vm414_vm4, %v417_v49, %v420_v29  ;;  %v3349_v49 = vld [vmem:[%s2897_s10 + $0x18] sm:$0xff] }
  0x8a   : > { %v1231_v54 = vand.u32 2147483647, %v1230_v4  ;;  %v1244_v26 = vadd.s32 3, %v1240_v15  ;;  %v1273_v56 = vshrl.u32 %v2799_v37, %v1270_v19  ;;  %v422_v3 = vsel %vm411_vm6, nan, %v421_v53 }
  0x8b   : > { %vm480_vm9 = vc.u32 %v3301_v27, %v3295_v40  ;;  %v1268_v57 = vshrl.u32 %v1267_v12, 5  ;;  %v1276_v58 = vshrl.u32 %v2800_v39, %v1270_v19  ;;  %2544 = vmatmul.mubr.msk.f32.vlgmr.msra.gmra.mrb[0].mxu0 %vm1882_vm2, %v422_v3  ;;  %v1278_v13 = vshll.u32 %v2800_v39, %v1269_v31 }
  0x8c   : > { %v1234_v61 = vmul.f32 %v1233_v20, %v1231_v54  ;;  %v482_v1 = vsel %vm480_vm9, %v481_v50, %v3296_v42  ;;  %v1274_v21 = vor.u32 %v1273_v56, %v1272_v52  ;;  %v1279_v9 = vshrl.u32 %v2801_v41, %v1270_v19 }
  0x8d   : > { %v483_v0 = vadd.s32 %v482_v1, %v478_v48  ;;  %v1277_v2 = vor.u32 %v1276_v58, %v1275_v36  ;;  %v1281_v8 = vshll.u32 %v2801_v41, %v1269_v31  ;;  %v1282_v7 = vshrl.u32 %v2802_v43, %v1270_v19 }
  0x8e   : > { %v1235_v33 = vxor.u32 2147483648, %v1234_v61  ;;  %v1284_v23 = vshll.u32 %v2802_v43, %v1269_v31  ;;  %v1285_v59 = vshrl.u32 %v2803_v51, %v1270_v19  ;;  %v1271_v11 = vshrl.u32 %v2798_v35, %v1270_v19 }
  0x8f   : > { %v484_v10 = vadd.s32 536870912, %v483_v0  ;;  %v1280_v14 = vor.u32 %v1279_v9, %v1278_v13  ;;  %vm1287_vm10 = vcmp.lt.s32.totalorder %v1268_v57, 1  ;;  %v1283_v16 = vor.u32 %v1282_v7, %v1281_v8 }
  0x90   : > { %v1236_v46 = vsel %vm1153_vm12, %v1235_v33, %v1234_v61  ;;  %v1286_v17 = vor.u32 %v1285_v59, %v1284_v23  ;;  %vm1290_vm11 = vcmp.lt.s32.totalorder %v1268_v57, 4  ;;  %vm1289_vm14 = vcmp.lt.s32.totalorder %v1268_v57, 3 }
  0x91   : > { %v1239_v22 = vsel %vm3251_vm13, %v2992_v63, %v1236_v46  ;;  %v485_v28 = vshrl.u32 %v484_v10, 30  ;;  %v1292_v12 = vsel %vm1290_vm11, %v1280_v14, 2102212464  ;;  %vm1288_vm15 = vcmp.lt.s32.totalorder %v1268_v57, 2 }
  0x92   : > { %2710 = vcosq.f32 %v1239_v22  ;;  %v1295_v60 = vsel %vm1287_vm10, %v1274_v21, %v1277_v2  ;;  %v1296_v15 = vsel %vm1290_vm11, %v1283_v16, 920167782  ;;  %v1291_v42 = vsel %vm1287_vm10, %v1271_v11, %v1274_v21  ;;  %v3379_v11 = vld [vmem:[%s2897_s10 + $0x58] sm:$0xff] }
  0x93   : > { %2712 = vsinq.f32 %v1239_v22  ;;  %v486_v38 = vshll.u32 %v485_v28, 30  ;;  %v1293_v55 = vsel %vm1289_vm14, %v1277_v2, %v1292_v12  ;;  %v1297_v25 = vsel %vm1289_vm14, %v1280_v14, %v1296_v15 }
  0x94   : > { %v1299_v62 = vsel %vm1287_vm10, %v1277_v2, %v1280_v14  ;;  %v1300_v6 = vsel %vm1290_vm11, %v1286_v17, 1326507024  ;;  %v1303_v30 = vshll.u32 %v1263_v18, 8  ;;  %v509_v34 = vsub.s32 4, %v485_v28 }
  0x95   : > { %v3340_v31 = vsub.s32 %v483_v0, %v486_v38  ;;  %v1298_v47 = vsel %vm1288_vm15, %v1295_v60, %v1297_v25  ;;  %v1301_v48 = vsel %vm1289_vm14, %v1283_v16, %v1300_v6  ;;  %v1245_v29 = vand.u32 3, %v1244_v26 }
  0x96   : > { %v1302_v4 = vsel %vm1288_vm15, %v1299_v62, %v1301_v48  ;;  %v3345_v20 = vmul.u32.u64.low %v1303_v30, %v1298_v47  ;;  %v3346_v19 = vmul.u32.u64.high %v1303_v30, %v1298_v47, %v3345_v20  ;;  %v1294_v5 = vsel %vm1288_vm15, %v1291_v42, %v1293_v55 }
  0x97   : > { %v489_v50 = vsub.s32 0, %v3340_v31  ;;  %v3353_v18 = vmul.u32.u64.low %v1303_v30, %v1302_v4  ;;  %v3354_v52 = vmul.u32.u64.high %v1303_v30, %v1302_v4, %v3353_v18  ;;  %vm425_vm12 = vcmp.lt.s32.totalorder %v3175_v24, 0 }
  0x98   : > { %v510_v53 = vsel %vm425_vm12, %v509_v34, %v485_v28  ;;  %v530_v54 = vand.u32 2139095040, %v3349_v49  ;;  %vm1243_vm13 = vweird.f32 %v2992_v63  ;;  %v1310_v26 = vmul.u32 %v1303_v30, %v1294_v5 }
  0x99   : > { %v2435_v36 = vmin.u32 %v489_v50, %v3340_v31  ;;  %v1313_v56 = vadd.s32 1, %v3346_v19  ;;  %vm1246_vm0 = vcmp.lt.s32.totalorder %v1245_v29, 2  ;;  %vm3365_vm1 = vcmp.le.f32.partialorder %v423_v44, 0.7853982 }
  0x9a   : > { %v527_v58 = vand.u32 2147483647, %v3349_v49  ;;  %vm1250_vm3 = vcmp.eq.s32.totalorder %v1245_v29, 2  ;;  %v512_v1 = vsel %vm3365_vm1, 0, %v510_v53  ;;  %vm1312_vm4 = vc.u32 %v3354_v52, %v3345_v20 }
  0x9b   : > { %v491_v57 = vclz %v2435_v36  ;;  %v531_v21 = vshrl.u32 %v530_v54, 23  ;;  %vm1247_vm5 = vcmp.eq.s32.totalorder %v1245_v29, 0  ;;  %v1314_v44 = vsel %vm1312_vm4, %v1313_v56, %v3346_v19 }
  0x9c   : > { %v2711_v61 = vpop.eup %2710  ;;  %v479_v8 = vadd.s32 %v3295_v40, %v3301_v27  ;;  %v1315_v33 = vadd.s32 %v1314_v44, %v1310_v26  ;;  %v516_v59 = vadd.s32 3, %v512_v1  ;;  %v534_v10 = vand.u32 8388607, %v527_v58 }
  0x9d   : > { %v2713_v13 = vpop.eup %2712  ;;  %v1251_v0 = vxor.u32 2147483648, %v2711_v61  ;;  %v2436_v2 = vadd.s32 4294967294, %v491_v57  ;;  %v2438_v7 = vadd.s32 4294967169, %v531_v21  ;;  %v1362_v15 = vand.u32 2139095040, %v3379_v11 }
  0x9e   : > { %v1248_v9 = vxor.u32 2147483648, %v2713_v13  ;;  %v1316_v16 = vadd.s32 536870912, %v1315_v33  ;;  %v535_v55 = vor.u32 8388608, %v534_v10  ;;  %vm1257_vm8 = vcmp.lt.s32.totalorder %v3205_v32, 0 }
  0x9f   : > { %v1252_v23 = vsel %vm1250_vm3, %v1251_v0, %v2713_v13  ;;  %vm2437_vm6 = vcmp.lt.s32.totalorder %v2436_v2, 0  ;;  %v537_v17 = vadd.s32 1, %v2438_v7  ;;  %v3388_v34 = vand.u32 3, %v516_v59 }
  0xa0   : > { %v1249_v14 = vsel %vm1247_vm5, %v2711_v61, %v1248_v9  ;;  %v494_v46 = vsel %vm2437_vm6, 0, %v2436_v2  ;;  %v1317_v60 = vshrl.u32 %v1316_v16, 30  ;;  %v1311_v63 = vadd.s32 %v3345_v20, %v3354_v52 }
  0xa1   : > { %v1253_v22 = vsel %vm1246_vm0, %v1249_v14, %v1252_v23  ;;  %v495_v28 = vsub.s32 32, %v494_v46  ;;  %v496_v12 = vshll.u32 %v3340_v31, %v494_v46  ;;  %v499_v40 = vsub.s32 4294967266, %v494_v46 }
  0xa2   : > { %v1254_v27 = vsel %vm1243_vm13, nan, %v1253_v22  ;;  %vm538_vm7 = vcmp.gt.s32.totalorder %v537_v17, 0  ;;  %v1318_v62 = vshll.u32 %v1317_v60, 30  ;;  %v1359_v29 = vand.u32 2147483647, %v3379_v11 }
  0xa3   : > { %2556 = vmatmul.mubr.msk.f32.vlgmr.msra.gmra.mrb[0].mxu1 %vm1882_vm2, %v1254_v27  ;;  %v497_v38 = vshrl.u32 %v479_v8, %v495_v28  ;;  %v500_v42 = vadd.s32 127, %v499_v40  ;;  %v539_v25 = vsel %vm538_vm7, %v537_v17, 0  ;;  %v1363_v4 = vshrl.u32 %v1362_v15, 23 }
  0xa4   : > { %v541_v6 = vand.u32 31, %v539_v25  ;;  %v3391_v47 = vsub.s32 %v1315_v33, %v1318_v62  ;;  %v1341_v5 = vsub.s32 4, %v1317_v60  ;;  %v3394_v18 = vshll.u32 %v535_v55, 8 }
  0xa5   : > { %v498_v30 = vor.u32 %v497_v38, %v496_v12  ;;  %v501_v31 = vshll.u32 %v500_v42, 23  ;;  %vm3405_vm9 = vcmp.le.f32.partialorder %v1255_v45, 0.7853982  ;;  %v540_v21 = vshrl.u32 %v539_v25, 5 }
  0xa6   : > { %v542_v48 = vsub.s32 32, %v541_v6  ;;  %v1321_v36 = vsub.s32 0, %v3391_v47  ;;  %v544_v53 = vshll.u32 %v2798_v35, %v541_v6  ;;  %v547_v26 = vshll.u32 %v2799_v37, %v541_v6 }
  0xa7   : > { %v502_v19 = vor.u32 4788187, %v501_v31  ;;  %v505_v50 = vcvt.s32.f32 %v498_v30  ;;  %v550_v56 = vshll.u32 %v2800_v39, %v541_v6  ;;  %v553_v13 = vshll.u32 %v2801_v41, %v541_v6 }
  0xa8   : > { %v545_v54 = vshrl.u32 %v2799_v37, %v542_v48  ;;  %v548_v52 = vshrl.u32 %v2800_v39, %v542_v48  ;;  %v551_v57 = vshrl.u32 %v2801_v41, %v542_v48  ;;  %v2467_v1 = vmin.u32 %v1321_v36, %v3391_v47 }
  0xa9   : > { %v503_v20 = vand.u32 2147483647, %v502_v19  ;;  %v2470_v0 = vadd.s32 4294967169, %v1363_v4  ;;  %v1342_v44 = vsel %vm1257_vm8, %v1341_v5, %v1317_v60  ;;  %v543_v9 = vshrl.u32 %v2798_v35, %v542_v48 }
  0xaa   : > { %v554_v8 = vshrl.u32 %v2802_v43, %v542_v48  ;;  %v1323_v33 = vclz %v2467_v1  ;;  %v546_v7 = vor.u32 %v545_v54, %v544_v53  ;;  %v549_v45 = vor.u32 %v548_v52, %v547_v26 }
  0xab   : > { %v506_v2 = vmul.f32 %v505_v50, %v503_v20  ;;  %v552_v23 = vor.u32 %v551_v57, %v550_v56  ;;  %v556_v14 = vshll.u32 %v2802_v43, %v541_v6  ;;  %v557_v46 = vshrl.u32 %v2803_v51, %v542_v48 }
  0xac   : > { %v555_v10 = vor.u32 %v554_v8, %v553_v13  ;;  %v2468_v16 = vadd.s32 4294967294, %v1323_v33  ;;  %vm559_vm10 = vcmp.lt.s32.totalorder %v540_v21, 1  ;;  %vm560_vm11 = vcmp.lt.s32.totalorder %v540_v21, 2 }
  0xad   : > { %v507_v59 = vxor.u32 2147483648, %v506_v2  ;;  %vm561_vm14 = vcmp.lt.s32.totalorder %v540_v21, 3  ;;  %v558_v22 = vor.u32 %v557_v46, %v556_v14  ;;  %vm562_vm15 = vcmp.lt.s32.totalorder %v540_v21, 4 }
  0xae   : > { %v563_v28 = vsel %vm559_vm10, %v543_v9, %v546_v7  ;;  %vm2469_vm13 = vcmp.lt.s32.totalorder %v2468_v16, 0  ;;  %v564_v40 = vsel %vm562_vm15, %v552_v23, 2102212464  ;;  %v567_v27 = vsel %vm559_vm10, %v546_v7, %v549_v45 }
  0xaf   : > { %v508_v17 = vsel %vm425_vm12, %v507_v59, %v506_v2  ;;  %v1326_v60 = vsel %vm2469_vm13, 0, %v2468_v16  ;;  %v565_v15 = vsel %vm561_vm14, %v549_v45, %v564_v40  ;;  %v568_v38 = vsel %vm562_vm15, %v555_v10, 920167782  ;;  %v3464_v40 = vld [vmem:[%s2897_s10 + $0x20] sm:$0xff] }
  0xb0   : > { %v511_v12 = vsel %vm3365_vm1, %v3175_v24, %v508_v17  ;;  %v1327_v42 = vsub.s32 32, %v1326_v60  ;;  %v1328_v55 = vshll.u32 %v3391_v47, %v1326_v60  ;;  %v1331_v25 = vsub.s32 4294967266, %v1326_v60 }
  0xb1   : > { %2714 = vcosq.f32 %v511_v12  ;;  %v1344_v3 = vsel %vm3405_vm9, 0, %v1342_v44  ;;  %v569_v62 = vsel %vm561_vm14, %v552_v23, %v568_v38  ;;  %v571_v6 = vsel %vm559_vm10, %v549_v45, %v552_v23 }
  0xb2   : > { %2716 = vsinq.f32 %v511_v12  ;;  %v572_v30 = vsel %vm562_vm15, %v558_v22, 1326507024  ;;  %v1329_v31 = vshrl.u32 %v1311_v63, %v1327_v42  ;;  %v1332_v48 = vadd.s32 127, %v1331_v25 }
  0xb3   : > { %v570_v4 = vsel %vm560_vm11, %v567_v27, %v569_v62  ;;  %v573_v19 = vsel %vm561_vm14, %v555_v10, %v572_v30  ;;  %v566_v50 = vsel %vm560_vm11, %v563_v28, %v565_v15  ;;  %v1366_v63 = vand.u32 8388607, %v1359_v29 }
  0xb4   : > { %v574_v47 = vsel %vm560_vm11, %v571_v6, %v573_v19  ;;  %v3438_v5 = vmul.u32.u64.low %v3394_v18, %v570_v4  ;;  %v3439_v36 = vmul.u32.u64.high %v3394_v18, %v570_v4, %v3438_v5  ;;  %v1330_v53 = vor.u32 %v1329_v31, %v1328_v55 }
  0xb5   : > { %v1333_v54 = vshll.u32 %v1332_v48, 23  ;;  %v3443_v26 = vmul.u32.u64.low %v3394_v18, %v574_v47  ;;  %v3444_v20 = vmul.u32.u64.high %v3394_v18, %v574_v47, %v3443_v26  ;;  %v1369_v52 = vadd.s32 1, %v2470_v0 }
  0xb6   : > { %v1337_v57 = vcvt.s32.f32 %v1330_v53  ;;  %v1348_v1 = vadd.s32 3, %v1344_v3  ;;  %v582_v21 = vmul.u32 %v3394_v18, %v566_v50  ;;  %vm515_vm12 = vweird.f32 %v3175_v24 }
  0xb7   : > { %v1334_v56 = vor.u32 4788187, %v1333_v54  ;;  %vm518_vm0 = vcmp.lt.s32.totalorder %v3388_v34, 2  ;;  %v585_v13 = vadd.s32 1, %v3439_v36  ;;  %vm1370_vm1 = vcmp.gt.s32.totalorder %v1369_v52, 0 }
  0xb8   : > { %vm519_vm3 = vcmp.eq.s32.totalorder %v3388_v34, 0  ;;  %vm584_vm4 = vc.u32 %v3444_v20, %v3438_v5  ;;  %v1371_v44 = vsel %vm1370_vm1, %v1369_v52, 0  ;;  %vm522_vm5 = vcmp.eq.s32.totalorder %v3388_v34, 2 }
  0xb9   : > { %v1335_v2 = vand.u32 2147483647, %v1334_v56  ;;  %v586_v9 = vsel %vm584_vm4, %v585_v13, %v3439_v36  ;;  %v1367_v18 = vor.u32 8388608, %v1366_v63  ;;  %v1373_v8 = vand.u32 31, %v1371_v44 }
  0xba   : > { %v3457_v23 = vand.u32 3, %v1348_v1  ;;  %v587_v59 = vadd.s32 %v586_v9, %v582_v21  ;;  %v3459_v14 = vshrl.u32 %v1371_v44, 5  ;;  %v634_v31 = vand.u32 2139095040, %v3464_v40 }
  0xbb   : > { %v2715_v0 = vpop.eup %2714  ;;  %v1338_v45 = vmul.f32 %v1337_v57, %v1335_v2  ;;  %v1374_v46 = vsub.s32 32, %v1373_v8  ;;  %v1376_v16 = vshll.u32 %v2798_v35, %v1373_v8  ;;  %v1379_v12 = vshll.u32 %v2799_v37, %v1373_v8 }
  0xbc   : > { %v2717_v33 = vpop.eup %2716  ;;  %v523_v7 = vxor.u32 2147483648, %v2715_v0  ;;  %v588_v28 = vadd.s32 536870912, %v587_v59  ;;  %v1382_v38 = vshll.u32 %v2800_v39, %v1373_v8  ;;  %v1385_v19 = vshll.u32 %v2801_v41, %v1373_v8 }
  0xbd   : > { %v520_v10 = vxor.u32 2147483648, %v2717_v33  ;;  %v1339_v22 = vxor.u32 2147483648, %v1338_v45  ;;  %v1377_v60 = vshrl.u32 %v2799_v37, %v1374_v46  ;;  %v1380_v15 = vshrl.u32 %v2800_v39, %v1374_v46 }
  0xbe   : > { %v524_v17 = vsel %vm522_vm5, %v523_v7, %v2717_v33  ;;  %v589_v25 = vshrl.u32 %v588_v28, 30  ;;  %v1383_v3 = vshrl.u32 %v2801_v41, %v1374_v46  ;;  %v1375_v30 = vshrl.u32 %v2798_v35, %v1374_v46 }
  0xbf   : > { %v521_v27 = vsel %vm519_vm3, %v2715_v0, %v520_v10  ;;  %v1340_v55 = vsel %vm1257_vm8, %v1339_v22, %v1338_v45  ;;  %v1378_v48 = vor.u32 %v1377_v60, %v1376_v16  ;;  %v1381_v4 = vor.u32 %v1380_v15, %v1379_v12 }
  0xc0   : > { %v525_v42 = vsel %vm518_vm0, %v521_v27, %v524_v17  ;;  %v1343_v6 = vsel %vm3405_vm9, %v3205_v32, %v1340_v55  ;;  %v590_v34 = vshll.u32 %v589_v25, 30  ;;  %v1386_v24 = vshrl.u32 %v2802_v43, %v1374_v46 }
  0xc1   : > { %v526_v62 = vsel %vm515_vm12, nan, %v525_v42  ;;  %2718 = vcosq.f32 %v1343_v6  ;;  %v1388_v50 = vshll.u32 %v2802_v43, %v1373_v8  ;;  %v1384_v61 = vor.u32 %v1383_v3, %v1382_v38 }
  0xc2   : > { %2546 = vmatprep.mubr.msk.f32.mxu0 %vm1882_vm2, %v526_v62  ;;  %2720 = vsinq.f32 %v1343_v6  ;;  %v3487_v47 = vsub.s32 %v587_v59, %v590_v34  ;;  %v1389_v36 = vshrl.u32 %v2803_v51, %v1374_v46  ;;  %vm1391_vm6 = vcmp.lt.s32.totalorder %v3459_v14, 1 }
  0xc3   : > { %vm529_vm7 = vcmp.lt.s32.totalorder %v3349_v49, 0  ;;  %v1387_v53 = vor.u32 %v1386_v24, %v1385_v19  ;;  %vm1393_vm8 = vcmp.lt.s32.totalorder %v3459_v14, 3  ;;  %v1407_v54 = vshll.u32 %v1367_v18, 8 }
  0xc4   : > { %vm1350_vm9 = vcmp.lt.s32.totalorder %v3457_v23, 2  ;;  %v593_v26 = vsub.s32 0, %v3487_v47  ;;  %v1390_v63 = vor.u32 %v1389_v36, %v1388_v50  ;;  %vm1392_vm10 = vcmp.lt.s32.totalorder %v3459_v14, 2 }
  0xc5   : > { %vm1394_vm11 = vcmp.lt.s32.totalorder %v3459_v14, 4  ;;  %vm1347_vm14 = vweird.f32 %v3205_v32  ;;  %v1399_v56 = vsel %vm1391_vm6, %v1378_v48, %v1381_v4  ;;  %v631_v1 = vand.u32 2147483647, %v3464_v40 }
  0xc6   : > { %v1396_v52 = vsel %vm1394_vm11, %v1384_v61, 2102212464  ;;  %v1400_v57 = vsel %vm1394_vm11, %v1387_v53, 920167782  ;;  %vm3503_vm15 = vcmp.le.f32.partialorder %v527_v58, 0.7853982  ;;  %v2439_v13 = vmin.u32 %v593_v26, %v3487_v47 }
  0xc7   : > { %v1395_v2 = vsel %vm1391_vm6, %v1375_v30, %v1378_v48  ;;  %v1401_v44 = vsel %vm1393_vm8, %v1384_v61, %v1400_v57  ;;  %v635_v0 = vshrl.u32 %v634_v31, 23  ;;  %v1397_v9 = vsel %vm1393_vm8, %v1381_v4, %v1396_v52 }
  0xc8   : > { %v1402_v18 = vsel %vm1392_vm10, %v1399_v56, %v1401_v44  ;;  %v1403_v58 = vsel %vm1391_vm6, %v1381_v4, %v1384_v61  ;;  %v1404_v8 = vsel %vm1394_vm11, %v1390_v63, 1326507024  ;;  %vm1351_vm13 = vcmp.eq.s32.totalorder %v3457_v23, 0 }
  0xc9   : > { %vm1354_vm12 = vcmp.eq.s32.totalorder %v3457_v23, 2  ;;  %v595_v33 = vclz %v2439_v13  ;;  %v613_v7 = vsub.s32 4, %v589_v25  ;;  %v1405_v45 = vsel %vm1393_vm8, %v1387_v53, %v1404_v8  ;;  %v3558_v23 = vld [vmem:[%s2897_s10 + $0x60] sm:$0xff] }
  0xca   : > { %v3522_v59 = vmul.u32.u64.low %v1407_v54, %v1402_v18  ;;  %v3523_v10 = vmul.u32.u64.high %v1407_v54, %v1402_v18, %v3522_v59  ;;  %v3528_v46 = vand.u32 8388607, %v631_v1  ;;  %v1398_v22 = vsel %vm1392_vm10, %v1395_v2, %v1397_v9 }
  0xcb   : > { %v2719_v16 = vpop.eup %2718  ;;  %v2440_v17 = vadd.s32 4294967294, %v595_v33  ;;  %v1406_v28 = vsel %vm1392_vm10, %v1403_v58, %v1405_v45  ;;  %v2442_v12 = vadd.s32 4294967169, %v635_v0  ;;  %v583_v15 = vadd.s32 %v3438_v5, %v3444_v20 }
  0xcc   : > { %v2721_v27 = vpop.eup %2720  ;;  %v1355_v60 = vxor.u32 2147483648, %v2719_v16  ;;  %v3536_v38 = vmul.u32.u64.low %v1407_v54, %v1406_v28  ;;  %v3537_v42 = vmul.u32.u64.high %v1407_v54, %v1406_v28, %v3536_v38  ;;  %v614_v3 = vsel %vm529_vm7, %v613_v7, %v589_v25 }
  0xcd   : > { %v1352_v55 = vxor.u32 2147483648, %v2721_v27  ;;  %vm2441_vm0 = vcmp.lt.s32.totalorder %v2440_v17, 0  ;;  %v641_v62 = vadd.s32 1, %v2442_v12  ;;  %v1414_v30 = vmul.u32 %v1407_v54, %v1398_v22 }
  0xce   : > { %v1356_v6 = vsel %vm1354_vm12, %v1355_v60, %v2721_v27  ;;  %v598_v14 = vsel %vm2441_vm0, 0, %v2440_v17  ;;  %v1417_v31 = vadd.s32 1, %v3523_v10  ;;  %v616_v25 = vsel %vm3503_vm15, 0, %v614_v3 }
  0xcf   : > { %v1353_v5 = vsel %vm1351_vm13, %v2719_v16, %v1352_v55  ;;  %v599_v20 = vsub.s32 32, %v598_v14  ;;  %v600_v34 = vshll.u32 %v3487_v47, %v598_v14  ;;  %v603_v48 = vsub.s32 4294967266, %v598_v14 }
  0xd0   : > { %v1357_v4 = vsel %vm1350_vm9, %v1353_v5, %v1356_v6  ;;  %vm1416_vm1 = vc.u32 %v3537_v42, %v3522_v59  ;;  %vm642_vm3 = vcmp.gt.s32.totalorder %v641_v62, 0  ;;  %v620_v63 = vadd.s32 3, %v616_v25 }
  0xd1   : > { %v1358_v19 = vsel %vm1347_vm14, nan, %v1357_v4  ;;  %v601_v24 = vshrl.u32 %v583_v15, %v599_v20  ;;  %v604_v50 = vadd.s32 127, %v603_v48  ;;  %v1418_v61 = vsel %vm1416_vm1, %v1417_v31, %v3523_v10 }
  0xd2   : > { %2558 = vmatprep.mubr.msk.f32.mxu1 %vm1882_vm2, %v1358_v19  ;;  %v1419_v47 = vadd.s32 %v1418_v61, %v1414_v30  ;;  %v643_v36 = vsel %vm642_vm3, %v641_v62, 0  ;;  %v639_v56 = vor.u32 8388608, %v3528_v46  ;;  %v1466_v2 = vand.u32 2139095040, %v3558_v23 }
  0xd3   : > { %v602_v53 = vor.u32 %v601_v24, %v600_v34  ;;  %v605_v54 = vshll.u32 %v604_v50, 23  ;;  %v645_v26 = vand.u32 31, %v643_v36  ;;  %v644_v0 = vshrl.u32 %v643_v36, 5 }
  0xd4   : > { %v1420_v52 = vadd.s32 536870912, %v1419_v47  ;;  %v3570_v22 = vand.u32 3, %v620_v63  ;;  %v3575_v60 = vshll.u32 %v639_v56, 8  ;;  %vm1361_vm4 = vcmp.lt.s32.totalorder %v3379_v11, 0 }
  0xd5   : > { %v606_v57 = vor.u32 4788187, %v605_v54  ;;  %v609_v32 = vcvt.s32.f32 %v602_v53  ;;  %v646_v13 = vsub.s32 32, %v645_v26  ;;  %v648_v9 = vshll.u32 %v2798_v35, %v645_v26 }
  0xd6   : > { %v1421_v44 = vshrl.u32 %v1420_v52, 30  ;;  %v651_v18 = vshll.u32 %v2799_v37, %v645_v26  ;;  %v657_v7 = vshll.u32 %v2801_v41, %v645_v26  ;;  %v654_v10 = vshll.u32 %v2800_v39, %v645_v26 }
  0xd7   : > { %v607_v58 = vand.u32 2147483647, %v606_v57  ;;  %v649_v8 = vshrl.u32 %v2799_v37, %v646_v13  ;;  %v652_v33 = vshrl.u32 %v2800_v39, %v646_v13  ;;  %v655_v46 = vshrl.u32 %v2801_v41, %v646_v13 }
  0xd8   : > { %v1422_v45 = vshll.u32 %v1421_v44, 30  ;;  %v658_v16 = vshrl.u32 %v2802_v43, %v646_v13  ;;  %v660_v27 = vshll.u32 %v2802_v43, %v645_v26  ;;  %v661_v3 = vshrl.u32 %v2803_v51, %v646_v13 }
  0xd9   : > { %v610_v17 = vmul.f32 %v609_v32, %v607_v58  ;;  %v650_v12 = vor.u32 %v649_v8, %v648_v9  ;;  %v653_v38 = vor.u32 %v652_v33, %v651_v18  ;;  %v656_v6 = vor.u32 %v655_v46, %v654_v10 }
  0xda   : > { %v3572_v28 = vsub.s32 %v1419_v47, %v1422_v45  ;;  %v659_v55 = vor.u32 %v658_v16, %v657_v7  ;;  %vm663_vm5 = vcmp.lt.s32.totalorder %v644_v0, 1  ;;  %v1467_v14 = vshrl.u32 %v1466_v2, 23 }
  0xdb   : > { %v611_v15 = vxor.u32 2147483648, %v610_v17  ;;  %v647_v31 = vshrl.u32 %v2798_v35, %v646_v13  ;;  %vm665_vm6 = vcmp.lt.s32.totalorder %v644_v0, 3  ;;  %vm666_vm8 = vcmp.lt.s32.totalorder %v644_v0, 4 }
  0xdc   : > { %v1425_v62 = vsub.s32 0, %v3572_v28  ;;  %v662_v34 = vor.u32 %v661_v3, %v660_v27  ;;  %v668_v48 = vsel %vm666_vm8, %v656_v6, 2102212464  ;;  %vm3590_vm9 = vcmp.le.f32.partialorder %v1359_v29, 0.7853982 }
  0xdd   : > { %v612_v30 = vsel %vm529_vm7, %v611_v15, %v610_v17  ;;  %vm664_vm7 = vcmp.lt.s32.totalorder %v644_v0, 2  ;;  %v671_v25 = vsel %vm663_vm5, %v650_v12, %v653_v38  ;;  %v672_v19 = vsel %vm666_vm8, %v659_v55, 920167782 }
  0xde   : > { %v615_v5 = vsel %vm3503_vm15, %v3349_v49, %v612_v30  ;;  %v2471_v20 = vmin.u32 %v1425_v62, %v3572_v28  ;;  %v1445_v24 = vsub.s32 4, %v1421_v44  ;;  %v1463_v50 = vand.u32 2147483647, %v3558_v23 }
  0xdf   : > { %2722 = vcosq.f32 %v615_v5  ;;  %v667_v61 = vsel %vm663_vm5, %v647_v31, %v650_v12  ;;  %v669_v47 = vsel %vm665_vm6, %v653_v38, %v668_v48  ;;  %v673_v36 = vsel %vm665_vm6, %v656_v6, %v672_v19 }
  0xe0   : > { %2724 = vsinq.f32 %v615_v5  ;;  %v1427_v21 = vclz %v2471_v20  ;;  %v675_v29 = vsel %vm663_vm5, %v653_v38, %v656_v6  ;;  %v1415_v53 = vadd.s32 %v3522_v59, %v3537_v42 }
  0xe1   : > { %v674_v26 = vsel %vm664_vm7, %v671_v25, %v673_v36  ;;  %v676_v63 = vsel %vm666_vm8, %v662_v34, 1326507024  ;;  %v2474_v32 = vadd.s32 4294967169, %v1467_v14  ;;  %vm619_vm10 = vweird.f32 %v3349_v49  ;;  %v3642_v36 = vld [vmem:[%s2897_s10 + $0x28] sm:$0xff] }
  0xe2   : > { %v2472_v54 = vadd.s32 4294967294, %v1427_v21  ;;  %v677_v52 = vsel %vm665_vm6, %v659_v55, %v676_v63  ;;  %v3607_v56 = vmul.u32.u64.low %v3575_v60, %v674_v26  ;;  %v3608_v57 = vmul.u32.u64.high %v3575_v60, %v674_v26, %v3607_v56 }
  0xe3   : > { %v1446_v13 = vsel %vm1361_vm4, %v1445_v24, %v1421_v44  ;;  %v670_v59 = vsel %vm664_vm7, %v667_v61, %v669_v47  ;;  %v678_v42 = vsel %vm664_vm7, %v675_v29, %v677_v52  ;;  %v1473_v58 = vadd.s32 1, %v2474_v32 }
  0xe4   : > { %vm2473_vm11 = vcmp.lt.s32.totalorder %v2472_v54, 0  ;;  %v3617_v9 = vmul.u32.u64.low %v3575_v60, %v678_v42  ;;  %v3618_v18 = vmul.u32.u64.high %v3575_v60, %v678_v42, %v3617_v9  ;;  %vm622_vm14 = vcmp.lt.s32.totalorder %v3570_v22, 2 }
  0xe5   : > { %v1430_v2 = vsel %vm2473_vm11, 0, %v2472_v54  ;;  %v686_v45 = vmul.u32 %v3575_v60, %v670_v59  ;;  %v689_v44 = vadd.s32 1, %v3608_v57  ;;  %v1470_v0 = vand.u32 8388607, %v1463_v50 }
  0xe6   : > { %v1431_v8 = vsub.s32 32, %v1430_v2  ;;  %v1432_v33 = vshll.u32 %v3572_v28, %v1430_v2  ;;  %v1435_v7 = vsub.s32 4294967266, %v1430_v2  ;;  %vm1474_vm15 = vcmp.gt.s32.totalorder %v1473_v58, 0 }
  0xe7   : > { %v1448_v16 = vsel %vm3590_vm9, 0, %v1446_v13  ;;  %v1475_v17 = vsel %vm1474_vm15, %v1473_v58, 0  ;;  %vm623_vm13 = vcmp.eq.s32.totalorder %v3570_v22, 0  ;;  %vm626_vm12 = vcmp.eq.s32.totalorder %v3570_v22, 2 }
  0xe8   : > { %v1433_v10 = vshrl.u32 %v1415_v53, %v1431_v8  ;;  %v1436_v46 = vadd.s32 127, %v1435_v7  ;;  %vm688_vm0 = vc.u32 %v3618_v18, %v3607_v56  ;;  %v1477_v28 = vand.u32 31, %v1475_v17 }
  0xe9   : > { %v2723_v12 = vpop.eup %2722  ;;  %v690_v55 = vsel %vm688_vm0, %v689_v44, %v3608_v57  ;;  %v1452_v62 = vadd.s32 3, %v1448_v16  ;;  %v1471_v20 = vor.u32 8388608, %v1470_v0  ;;  %v1476_v22 = vshrl.u32 %v1475_v17, 5 }
  0xea   : > { %v2725_v27 = vpop.eup %2724  ;;  %v627_v60 = vxor.u32 2147483648, %v2723_v12  ;;  %v1434_v15 = vor.u32 %v1433_v10, %v1432_v33  ;;  %v1437_v38 = vshll.u32 %v1436_v46, 23  ;;  %v691_v6 = vadd.s32 %v690_v55, %v686_v45 }
  0xeb   : > { %v624_v3 = vxor.u32 2147483648, %v2725_v27  ;;  %v1478_v14 = vsub.s32 32, %v1477_v28  ;;  %v1480_v25 = vshll.u32 %v2798_v35, %v1477_v28  ;;  %v1483_v19 = vshll.u32 %v2799_v37, %v1477_v28 }
  0xec   : > { %v628_v30 = vsel %vm626_vm12, %v627_v60, %v2725_v27  ;;  %v1438_v31 = vor.u32 4788187, %v1437_v38  ;;  %v1441_v5 = vcvt.s32.f32 %v1434_v15  ;;  %v692_v48 = vadd.s32 536870912, %v691_v6 }
  0xed   : > { %v625_v34 = vsel %vm623_vm13, %v2723_v12, %v624_v3  ;;  %v1481_v61 = vshrl.u32 %v2799_v37, %v1478_v14  ;;  %v1484_v47 = vshrl.u32 %v2800_v39, %v1478_v14  ;;  %v1486_v54 = vshll.u32 %v2800_v39, %v1477_v28 }
  0xee   : > { %v629_v21 = vsel %vm622_vm14, %v625_v34, %v628_v30  ;;  %v1439_v24 = vand.u32 2147483647, %v1438_v31  ;;  %v693_v53 = vshrl.u32 %v692_v48, 30  ;;  %v1487_v26 = vshrl.u32 %v2801_v41, %v1478_v14 }
  0xef   : > { %v630_v29 = vsel %vm619_vm10, nan, %v629_v21  ;;  %v1489_v52 = vshll.u32 %v2801_v41, %v1477_v28  ;;  %v1490_v57 = vshrl.u32 %v2802_v43, %v1478_v14  ;;  %v1492_v13 = vshll.u32 %v2802_v43, %v1477_v28 }
  0xf0   : > { %2547 = vmatmul.mubr.msk.f32.gmra.mrb[2].mxu0 %vm1882_vm2, %v630_v29  ;;  %v1442_v63 = vmul.f32 %v1441_v5, %v1439_v24  ;;  %v694_v32 = vshll.u32 %v693_v53, 30  ;;  %v3652_v59 = vshll.u32 %v1471_v20, 8  ;;  %v738_v49 = vand.u32 2139095040, %v3642_v36 }
  0xf1   : > { %v1479_v2 = vshrl.u32 %v2798_v35, %v1478_v14  ;;  %v1491_v9 = vor.u32 %v1490_v57, %v1489_v52  ;;  %v1493_v58 = vshrl.u32 %v2803_v51, %v1478_v14  ;;  %v1482_v33 = vor.u32 %v1481_v61, %v1480_v25 }
  0xf2   : > { %v1443_v42 = vxor.u32 2147483648, %v1442_v63  ;;  %v3657_v8 = vsub.s32 %v691_v6, %v694_v32  ;;  %v1485_v7 = vor.u32 %v1484_v47, %v1483_v19  ;;  %v1488_v45 = vor.u32 %v1487_v26, %v1486_v54 }
  0xf3   : > { %v1494_v0 = vor.u32 %v1493_v58, %v1492_v13  ;;  %vm1495_vm1 = vcmp.lt.s32.totalorder %v1476_v22, 1  ;;  %vm1498_vm3 = vcmp.lt.s32.totalorder %v1476_v22, 4  ;;  %vm1496_vm5 = vcmp.lt.s32.totalorder %v1476_v22, 2 }
  0xf4   : > { %v1444_v44 = vsel %vm1361_vm4, %v1443_v42, %v1442_v63  ;;  %v697_v46 = vsub.s32 0, %v3657_v8  ;;  %vm1497_vm6 = vcmp.lt.s32.totalorder %v1476_v22, 3  ;;  %v1499_v16 = vsel %vm1495_vm1, %v1479_v2, %v1482_v33 }
  0xf5   : > { %v1447_v10 = vsel %vm3590_vm9, %v3379_v11, %v1444_v44  ;;  %v1500_v17 = vsel %vm1498_vm3, %v1488_v45, 2102212464  ;;  %v1504_v12 = vsel %vm1498_vm3, %v1491_v9, 920167782  ;;  %v1503_v60 = vsel %vm1495_vm1, %v1482_v33, %v1485_v7 }
  0xf6   : > { %2726 = vcosq.f32 %v1447_v10  ;;  %v2443_v28 = vmin.u32 %v697_v46, %v3657_v8  ;;  %v1501_v27 = vsel %vm1497_vm6, %v1485_v7, %v1500_v17  ;;  %vm633_vm4 = vcmp.lt.s32.totalorder %v3464_v40, 0 }
  0xf7   : > { %2728 = vsinq.f32 %v1447_v10  ;;  %v1505_v4 = vsel %vm1497_vm6, %v1488_v45, %v1504_v12  ;;  %v1507_v15 = vsel %vm1495_vm1, %v1485_v7, %v1488_v45  ;;  %v1508_v38 = vsel %vm1498_vm3, %v1494_v0, 1326507024  ;;  %v3712_v45 = vld [vmem:[%s2897_s10 + $0x68] sm:$0xff] }
  0xf8   : > { %v1453_v55 = vand.u32 3, %v1452_v62  ;;  %vm3677_vm8 = vcmp.le.f32.partialorder %v631_v1, 0.7853982  ;;  %v699_v6 = vclz %v2443_v28  ;;  %v717_v14 = vsub.s32 4, %v693_v53 }
  0xf9   : > { %v1502_v30 = vsel %vm1496_vm5, %v1499_v16, %v1501_v27  ;;  %v1506_v31 = vsel %vm1496_vm5, %v1503_v60, %v1505_v4  ;;  %v1509_v5 = vsel %vm1497_vm6, %v1491_v9, %v1508_v38  ;;  %v739_v20 = vshrl.u32 %v738_v49, 23 }
  0xfa   : > { %v2444_v34 = vadd.s32 4294967294, %v699_v6  ;;  %v1510_v48 = vsel %vm1496_vm5, %v1507_v15, %v1509_v5  ;;  %v3686_v62 = vmul.u32.u64.low %v3652_v59, %v1506_v31  ;;  %v3687_v25 = vmul.u32.u64.high %v3652_v59, %v1506_v31, %v3686_v62 }
  0xfb   : > { %v3691_v1 = vmul.u32.u64.low %v3652_v59, %v1510_v48  ;;  %v3692_v19 = vmul.u32.u64.high %v3652_v59, %v1510_v48, %v3691_v1  ;;  %v735_v21 = vand.u32 2147483647, %v3642_v36  ;;  %v2446_v24 = vadd.s32 4294967169, %v739_v20 }
  0xfc   : > { %vm1455_vm9 = vcmp.eq.s32.totalorder %v1453_v55, 0  ;;  %v687_v61 = vadd.s32 %v3607_v56, %v3618_v18  ;;  %vm2445_vm7 = vcmp.lt.s32.totalorder %v2444_v34, 0  ;;  %v718_v47 = vsel %vm633_vm4, %v717_v14, %v693_v53 }
  0xfd   : > { %vm1458_vm10 = vcmp.eq.s32.totalorder %v1453_v55, 2  ;;  %v702_v29 = vsel %vm2445_vm7, 0, %v2444_v34  ;;  %v1518_v54 = vmul.u32 %v3652_v59, %v1502_v30  ;;  %v745_v26 = vadd.s32 1, %v2446_v24 }
  0xfe   : > { %v703_v63 = vsub.s32 32, %v702_v29  ;;  %v704_v22 = vshll.u32 %v3657_v8, %v702_v29  ;;  %v707_v52 = vsub.s32 4294967266, %v702_v29  ;;  %v1521_v57 = vadd.s32 1, %v3687_v25 }
  0xff   : > { %v720_v13 = vsel %vm3677_vm8, 0, %v718_v47  ;;  %vm1520_vm11 = vc.u32 %v3692_v19, %v3686_v62  ;;  %v742_v56 = vand.u32 8388607, %v735_v21  ;;  %vm746_vm14 = vcmp.gt.s32.totalorder %v745_v26, 0 }
 0x100   : > { %v2727_v32 = vpop.eup %2726  ;;  %v705_v59 = vshrl.u32 %v687_v61, %v703_v63  ;;  %v708_v49 = vadd.s32 127, %v707_v52  ;;  %v1522_v42 = vsel %vm1520_vm11, %v1521_v57, %v3687_v25  ;;  %vm1454_vm15 = vcmp.lt.s32.totalorder %v1453_v55, 2 }
 0x101   : > { %v2729_v18 = vpop.eup %2728  ;;  %v1459_v53 = vxor.u32 2147483648, %v2727_v32  ;;  %v1523_v9 = vadd.s32 %v1522_v42, %v1518_v54  ;;  %v747_v58 = vsel %vm746_vm14, %v745_v26, 0  ;;  %vm1451_vm13 = vweird.f32 %v3379_v11 }
 0x102   : > { %v1456_v2 = vxor.u32 2147483648, %v2729_v18  ;;  %v706_v33 = vor.u32 %v705_v59, %v704_v22  ;;  %v709_v7 = vshll.u32 %v708_v49, 23  ;;  %v724_v0 = vadd.s32 3, %v720_v13 }
 0x103   : > { %v1460_v8 = vsel %vm1458_vm10, %v1459_v53, %v2729_v18  ;;  %v1524_v10 = vadd.s32 536870912, %v1523_v9  ;;  %v749_v46 = vand.u32 31, %v747_v58  ;;  %v743_v28 = vor.u32 8388608, %v742_v56 }
 0x104   : > { %v1457_v44 = vsel %vm1455_vm9, %v2727_v32, %v1456_v2  ;;  %v710_v17 = vor.u32 4788187, %v709_v7  ;;  %v713_v12 = vcvt.s32.f32 %v706_v33  ;;  %v1570_v11 = vand.u32 2139095040, %v3712_v45 }
 0x105   : > { %v1461_v16 = vsel %vm1454_vm15, %v1457_v44, %v1460_v8  ;;  %v1525_v60 = vshrl.u32 %v1524_v10, 30  ;;  %v750_v4 = vsub.s32 32, %v749_v46  ;;  %v748_v38 = vshrl.u32 %v747_v58, 5 }
 0x106   : > { %v1462_v27 = vsel %vm1451_vm13, nan, %v1461_v16  ;;  %v711_v15 = vand.u32 2147483647, %v710_v17  ;;  %v752_v6 = vshll.u32 %v2798_v35, %v749_v46  ;;  %v755_v55 = vshll.u32 %v2799_v37, %v749_v46 }
 0x107   : > { %2559 = vmatmul.mubr.msk.f32.gmra.mrb[2].mxu1 %vm1882_vm2, %v1462_v27  ;;  %v1526_v14 = vshll.u32 %v1525_v60, 30  ;;  %v753_v30 = vshrl.u32 %v2799_v37, %v750_v4  ;;  %v758_v31 = vshll.u32 %v2800_v39, %v749_v46  ;;  %v761_v5 = vshll.u32 %v2801_v41, %v749_v46 }
 0x108   : > { %v714_v20 = vmul.f32 %v713_v12, %v711_v15  ;;  %v756_v34 = vshrl.u32 %v2800_v39, %v750_v4  ;;  %v759_v48 = vshrl.u32 %v2801_v41, %v750_v4  ;;  %v762_v25 = vshrl.u32 %v2802_v43, %v750_v4 }
 0x109   : > { %v3725_v1 = vand.u32 3, %v724_v0  ;;  %v3727_v24 = vsub.s32 %v1523_v9, %v1526_v14  ;;  %v764_v61 = vshll.u32 %v2802_v43, %v749_v46  ;;  %v751_v29 = vshrl.u32 %v2798_v35, %v750_v4 }
 0x10a   : > { %v715_v47 = vxor.u32 2147483648, %v714_v20  ;;  %v3731_v54 = vshll.u32 %v743_v28, 8  ;;  %v1571_v26 = vshrl.u32 %v1570_v11, 23  ;;  %vm1465_vm12 = vcmp.lt.s32.totalorder %v3558_v23, 0 }
 0x10b   : > { %v1529_v63 = vsub.s32 0, %v3727_v24  ;;  %v754_v22 = vor.u32 %v753_v30, %v752_v6  ;;  %v757_v52 = vor.u32 %v756_v34, %v755_v55  ;;  %v765_v57 = vshrl.u32 %v2803_v51, %v750_v4 }
 0x10c   : > { %v716_v32 = vsel %vm633_vm4, %v715_v47, %v714_v20  ;;  %v760_v13 = vor.u32 %v759_v48, %v758_v31  ;;  %v763_v56 = vor.u32 %v762_v25, %v761_v5  ;;  %vm767_vm0 = vcmp.lt.s32.totalorder %v748_v38, 1 }
 0x10d   : > { %v719_v18 = vsel %vm3677_vm8, %v3464_v40, %v716_v32  ;;  %v2475_v53 = vmin.u32 %v1529_v63, %v3727_v24  ;;  %v766_v59 = vor.u32 %v765_v57, %v764_v61  ;;  %vm770_vm1 = vcmp.lt.s32.totalorder %v748_v38, 4 }
 0x10e   : > { %2730 = vcosq.f32 %v719_v18  ;;  %vm768_vm3 = vcmp.lt.s32.totalorder %v748_v38, 2  ;;  %vm769_vm5 = vcmp.lt.s32.totalorder %v748_v38, 3  ;;  %v772_v49 = vsel %vm770_vm1, %v760_v13, 2102212464 }
 0x10f   : > { %2732 = vsinq.f32 %v719_v18  ;;  %v1531_v42 = vclz %v2475_v53  ;;  %v771_v2 = vsel %vm767_vm0, %v751_v29, %v754_v22  ;;  %v775_v9 = vsel %vm767_vm0, %v754_v22, %v757_v52 }
 0x110   : > { %v1549_v58 = vsub.s32 4, %v1525_v60  ;;  %v773_v8 = vsel %vm769_vm5, %v757_v52, %v772_v49  ;;  %v776_v3 = vsel %vm770_vm1, %v763_v56, 920167782  ;;  %v779_v33 = vsel %vm767_vm0, %v757_v52, %v760_v13 }
 0x111   : > { %v1519_v7 = vadd.s32 %v3686_v62, %v3692_v19  ;;  %v2476_v44 = vadd.s32 4294967294, %v1531_v42  ;;  %v777_v0 = vsel %vm769_vm5, %v760_v13, %v776_v3  ;;  %v780_v10 = vsel %vm770_vm1, %v766_v59, 1326507024 }
 0x112   : > { %v774_v46 = vsel %vm768_vm3, %v771_v2, %v773_v8  ;;  %v778_v16 = vsel %vm768_vm3, %v775_v9, %v777_v0  ;;  %v781_v17 = vsel %vm769_vm5, %v763_v56, %v780_v10  ;;  %v2478_v12 = vadd.s32 4294967169, %v1571_v26 }
 0x113   : > { %vm2477_vm6 = vcmp.lt.s32.totalorder %v2476_v44, 0  ;;  %v782_v28 = vsel %vm768_vm3, %v779_v33, %v781_v17  ;;  %v3757_v27 = vmul.u32.u64.low %v3731_v54, %v778_v16  ;;  %v3758_v4 = vmul.u32.u64.high %v3731_v54, %v778_v16, %v3757_v27 }
 0x114   : > { %v1534_v62 = vsel %vm2477_vm6, 0, %v2476_v44  ;;  %v1550_v19 = vsel %vm1465_vm12, %v1549_v58, %v1525_v60  ;;  %v3764_v11 = vmul.u32.u64.low %v3731_v54, %v782_v28  ;;  %v3765_v15 = vmul.u32.u64.high %v3731_v54, %v782_v28, %v3764_v11 }
 0x115   : > { %v1535_v6 = vsub.s32 32, %v1534_v62  ;;  %v1536_v55 = vshll.u32 %v3727_v24, %v1534_v62  ;;  %v1539_v14 = vsub.s32 4294967266, %v1534_v62  ;;  %v1577_v30 = vadd.s32 1, %v2478_v12 }
 0x116   : > { %vm727_vm4 = vcmp.eq.s32.totalorder %v3725_v1, 0  ;;  %vm730_vm8 = vcmp.eq.s32.totalorder %v3725_v1, 2  ;;  %vm3772_vm9 = vcmp.le.f32.partialorder %v1463_v50, 0.7853982  ;;  %v790_v60 = vmul.u32 %v3731_v54, %v774_v46 }
 0x117   : > { %v1537_v31 = vshrl.u32 %v1519_v7, %v1535_v6  ;;  %v1540_v5 = vadd.s32 127, %v1539_v14  ;;  %v793_v20 = vadd.s32 1, %v3758_v4  ;;  %vm1578_vm7 = vcmp.gt.s32.totalorder %v1577_v30, 0 }
 0x118   : > { %v2731_v34 = vpop.eup %2730  ;;  %v1552_v48 = vsel %vm3772_vm9, 0, %v1550_v19  ;;  %vm792_vm10 = vc.u32 %v3765_v15, %v3757_v27  ;;  %v1567_v25 = vand.u32 2147483647, %v3712_v45  ;;  %v1579_v50 = vsel %vm1578_vm7, %v1577_v30, 0 }
 0x119   : > { %v2733_v24 = vpop.eup %2732  ;;  %v731_v61 = vxor.u32 2147483648, %v2731_v34  ;;  %v1538_v47 = vor.u32 %v1537_v31, %v1536_v55  ;;  %v1541_v29 = vshll.u32 %v1540_v5, 23  ;;  %v794_v54 = vsel %vm792_vm10, %v793_v20, %v3758_v4 }
 0x11a   : > { %vm726_vm11 = vcmp.lt.s32.totalorder %v3725_v1, 2  ;;  %v728_v26 = vxor.u32 2147483648, %v2733_v24  ;;  %v795_v63 = vadd.s32 %v794_v54, %v790_v60  ;;  %v1581_v22 = vand.u32 31, %v1579_v50 }
 0x11b   : > { %vm723_vm14 = vweird.f32 %v3464_v40  ;;  %v732_v52 = vsel %vm730_vm8, %v731_v61, %v2733_v24  ;;  %v1542_v57 = vor.u32 4788187, %v1541_v29  ;;  %v1545_v32 = vcvt.s32.f32 %v1538_v47 }
 0x11c   : > { %v729_v13 = vsel %vm727_vm4, %v2731_v34, %v728_v26  ;;  %v1556_v56 = vadd.s32 3, %v1552_v48  ;;  %v796_v18 = vadd.s32 536870912, %v795_v63  ;;  %v1582_v53 = vsub.s32 32, %v1581_v22  ;;  %v3830_v48 = vld [vmem:[%s2897_s10 + $0x30] sm:$0xff] }
 0x11d   : > { %v733_v59 = vsel %vm726_vm11, %v729_v13, %v732_v52  ;;  %v1543_v49 = vand.u32 2147483647, %v1542_v57  ;;  %v1574_v42 = vand.u32 8388607, %v1567_v25  ;;  %v3792_v2 = vshrl.u32 %v1579_v50, 5 }
 0x11e   : > { %v734_v9 = vsel %vm723_vm14, nan, %v733_v59  ;;  %v797_v40 = vshrl.u32 %v796_v18, 30  ;;  %v1584_v58 = vshll.u32 %v2798_v35, %v1581_v22  ;;  %v1587_v8 = vshll.u32 %v2799_v37, %v1581_v22 }
 0x11f   : > { %2549 = vmatprep.mubr.msk.f32.mxu0 %vm1882_vm2, %v734_v9  ;;  %v1546_v1 = vmul.f32 %v1545_v32, %v1543_v49  ;;  %v1585_v3 = vshrl.u32 %v2799_v37, %v1582_v53  ;;  %v1588_v33 = vshrl.u32 %v2800_v39, %v1582_v53  ;;  %v1593_v7 = vshll.u32 %v2801_v41, %v1581_v22 }
 0x120   : > { %v798_v44 = vshll.u32 %v797_v40, 30  ;;  %v1590_v0 = vshll.u32 %v2800_v39, %v1581_v22  ;;  %v1591_v10 = vshrl.u32 %v2801_v41, %v1582_v53  ;;  %v1594_v46 = vshrl.u32 %v2802_v43, %v1582_v53 }
 0x121   : > { %v1547_v16 = vxor.u32 2147483648, %v1546_v1  ;;  %v3803_v17 = vand.u32 3, %v1556_v56  ;;  %vm737_vm15 = vcmp.lt.s32.totalorder %v3642_v36, 0  ;;  %v1596_v12 = vshll.u32 %v2802_v43, %v1581_v22 }
 0x122   : > { %v3807_v28 = vsub.s32 %v795_v63, %v798_v44  ;;  %v1575_v4 = vor.u32 8388608, %v1574_v42  ;;  %v1583_v62 = vshrl.u32 %v2798_v35, %v1582_v53  ;;  %v1597_v19 = vshrl.u32 %v2803_v51, %v1582_v53 }
 0x123   : > { %v1548_v11 = vsel %vm1465_vm12, %v1547_v16, %v1546_v1  ;;  %v1586_v6 = vor.u32 %v1585_v3, %v1584_v58  ;;  %v1589_v55 = vor.u32 %v1588_v33, %v1587_v8  ;;  %v1595_v14 = vor.u32 %v1594_v46, %v1593_v7 }
 0x124   : > { %v1551_v30 = vsel %vm3772_vm9, %v3558_v23, %v1548_v11  ;;  %vm3818_vm13 = vcmp.le.f32.partialorder %v735_v21, 0.7853982  ;;  %v801_v31 = vsub.s32 0, %v3807_v28  ;;  %v1592_v5 = vor.u32 %v1591_v10, %v1590_v0 }
 0x125   : > { %vm1599_vm0 = vcmp.lt.s32.totalorder %v3792_v2, 1  ;;  %2734 = vcosq.f32 %v1551_v30  ;;  %v821_v20 = vsub.s32 4, %v797_v40  ;;  %v1598_v34 = vor.u32 %v1597_v19, %v1596_v12 }
 0x126   : > { %vm1602_vm12 = vcmp.lt.s32.totalorder %v3792_v2, 4  ;;  %2736 = vsinq.f32 %v1551_v30  ;;  %v2447_v38 = vmin.u32 %v801_v31, %v3807_v28  ;;  %vm1601_vm1 = vcmp.lt.s32.totalorder %v3792_v2, 3 }
 0x127   : > { %v1604_v21 = vsel %vm1602_vm12, %v1592_v5, 2102212464  ;;  %vm1600_vm3 = vcmp.lt.s32.totalorder %v3792_v2, 2  ;;  %v1607_v50 = vsel %vm1599_vm0, %v1586_v6, %v1589_v55  ;;  %v1608_v24 = vsel %vm1602_vm12, %v1595_v14, 920167782 }
 0x128   : > { %v1615_v61 = vshll.u32 %v1575_v4, 8  ;;  %v791_v47 = vadd.s32 %v3757_v27, %v3765_v15  ;;  %v803_v29 = vclz %v2447_v38  ;;  %v1603_v54 = vsel %vm1599_vm0, %v1583_v62, %v1586_v6 }
 0x129   : > { %v1611_v26 = vsel %vm1599_vm0, %v1589_v55, %v1592_v5  ;;  %vm1558_vm5 = vcmp.lt.s32.totalorder %v3803_v17, 2  ;;  %v1605_v63 = vsel %vm1601_vm1, %v1589_v55, %v1604_v21  ;;  %v1609_v22 = vsel %vm1601_vm1, %v1592_v5, %v1608_v24  ;;  %v3886_v21 = vld [vmem:[%s2897_s10 + $0x70] sm:$0xff] }
 0x12a   : > { %v1612_v52 = vsel %vm1602_vm12, %v1598_v34, 1326507024  ;;  %v842_v27 = vand.u32 2139095040, %v3830_v48  ;;  %vm1555_vm6 = vweird.f32 %v3558_v23  ;;  %v2448_v15 = vadd.s32 4294967294, %v803_v29 }
 0x12b   : > { %v822_v57 = vsel %vm737_vm15, %v821_v20, %v797_v40  ;;  %v1610_v32 = vsel %vm1600_vm3, %v1607_v50, %v1609_v22  ;;  %v1613_v13 = vsel %vm1601_vm1, %v1595_v14, %v1612_v52  ;;  %v1606_v49 = vsel %vm1600_vm3, %v1603_v54, %v1605_v63 }
 0x12c   : > { %v1614_v56 = vsel %vm1600_vm3, %v1611_v26, %v1613_v13  ;;  %v3860_v18 = vmul.u32.u64.low %v1615_v61, %v1610_v32  ;;  %v3861_v53 = vmul.u32.u64.high %v1615_v61, %v1610_v32, %v3860_v18  ;;  %v843_v59 = vshrl.u32 %v842_v27, 23 }
 0x12d   : > { %vm2449_vm4 = vcmp.lt.s32.totalorder %v2448_v15, 0  ;;  %v3866_v42 = vmul.u32.u64.low %v1615_v61, %v1614_v56  ;;  %v3867_v9 = vmul.u32.u64.high %v1615_v61, %v1614_v56, %v3866_v42  ;;  %v824_v58 = vsel %vm3818_vm13, 0, %v822_v57 }
 0x12e   : > { %v806_v40 = vsel %vm2449_vm4, 0, %v2448_v15  ;;  %v839_v8 = vand.u32 2147483647, %v3830_v48  ;;  %v2450_v1 = vadd.s32 4294967169, %v843_v59  ;;  %vm1559_vm8 = vcmp.eq.s32.totalorder %v3803_v17, 0 }
 0x12f   : > { %v807_v3 = vsub.s32 32, %v806_v40  ;;  %v808_v33 = vshll.u32 %v3807_v28, %v806_v40  ;;  %v811_v7 = vsub.s32 4294967266, %v806_v40  ;;  %v2735_v44 = vpop.eup %2734  ;;  %vm1562_vm9 = vcmp.eq.s32.totalorder %v3803_v17, 2 }
 0x130   : > { %v1622_v2 = vmul.u32 %v1615_v61, %v1606_v49  ;;  %v1625_v0 = vadd.s32 1, %v3861_v53  ;;  %v849_v10 = vadd.s32 1, %v2450_v1  ;;  %v2737_v46 = vpop.eup %2736  ;;  %v1563_v16 = vxor.u32 2147483648, %v2735_v44 }
 0x131   : > { %v809_v12 = vshrl.u32 %v791_v47, %v807_v3  ;;  %v812_v4 = vadd.s32 127, %v811_v7  ;;  %v828_v62 = vadd.s32 3, %v824_v58  ;;  %v1560_v19 = vxor.u32 2147483648, %v2737_v46 }
 0x132   : > { %vm1624_vm7 = vc.u32 %v3867_v9, %v3860_v18  ;;  %v846_v28 = vand.u32 8388607, %v839_v8  ;;  %vm850_vm10 = vcmp.gt.s32.totalorder %v849_v10, 0  ;;  %v1564_v11 = vsel %vm1562_vm9, %v1563_v16, %v2737_v46 }
 0x133   : > { %v810_v6 = vor.u32 %v809_v12, %v808_v33  ;;  %v813_v55 = vshll.u32 %v812_v4, 23  ;;  %v1626_v14 = vsel %vm1624_vm7, %v1625_v0, %v3861_v53  ;;  %v1561_v30 = vsel %vm1559_vm8, %v2735_v44, %v1560_v19 }
 0x134   : > { %v1627_v31 = vadd.s32 %v1626_v14, %v1622_v2  ;;  %v851_v5 = vsel %vm850_vm10, %v849_v10, 0  ;;  %v1565_v20 = vsel %vm1558_vm5, %v1561_v30, %v1564_v11  ;;  %v3891_v29 = vand.u32 3, %v828_v62 }
 0x135   : > { %v814_v34 = vor.u32 4788187, %v813_v55  ;;  %v817_v38 = vcvt.s32.f32 %v810_v6  ;;  %v1566_v50 = vsel %vm1555_vm6, nan, %v1565_v20  ;;  %v853_v61 = vand.u32 31, %v851_v5 }
 0x136   : > { %v1628_v24 = vadd.s32 536870912, %v1627_v31  ;;  %2561 = vmatprep.mubr.msk.f32.mxu1 %vm1882_vm2, %v1566_v50  ;;  %v847_v54 = vor.u32 8388608, %v846_v28  ;;  %v852_v63 = vshrl.u32 %v851_v5, 5  ;;  %v1674_v17 = vand.u32 2139095040, %v3886_v21 }
 0x137   : > { %v815_v47 = vand.u32 2147483647, %v814_v34  ;;  %v854_v22 = vsub.s32 32, %v853_v61  ;;  %v856_v27 = vshll.u32 %v2798_v35, %v853_v61  ;;  %v859_v15 = vshll.u32 %v2799_v37, %v853_v61 }
 0x138   : > { %v1629_v26 = vshrl.u32 %v1628_v24, 30  ;;  %v862_v23 = vshll.u32 %v2800_v39, %v853_v61  ;;  %v865_v13 = vshll.u32 %v2801_v41, %v853_v61  ;;  %v868_v56 = vshll.u32 %v2802_v43, %v853_v61 }
 0x139   : > { %v818_v52 = vmul.f32 %v817_v38, %v815_v47  ;;  %v857_v32 = vshrl.u32 %v2799_v37, %v854_v22  ;;  %vm1569_vm11 = vcmp.lt.s32.totalorder %v3712_v45, 0  ;;  %v860_v59 = vshrl.u32 %v2800_v39, %v854_v22 }
 0x13a   : > { %v1630_v57 = vshll.u32 %v1629_v26, 30  ;;  %v863_v49 = vshrl.u32 %v2801_v41, %v854_v22  ;;  %v866_v42 = vshrl.u32 %v2802_v43, %v854_v22  ;;  %v869_v58 = vshrl.u32 %v2803_v51, %v854_v22 }
 0x13b   : > { %v819_v53 = vxor.u32 2147483648, %v818_v52  ;;  %vm871_vm14 = vcmp.lt.s32.totalorder %v852_v63, 1  ;;  %v1675_v1 = vshrl.u32 %v1674_v17, 23  ;;  %v855_v33 = vshrl.u32 %v2798_v35, %v854_v22 }
 0x13c   : > { %v3904_v40 = vsub.s32 %v1627_v31, %v1630_v57  ;;  %v858_v7 = vor.u32 %v857_v32, %v856_v27  ;;  %v861_v44 = vor.u32 %v860_v59, %v859_v15  ;;  %vm3915_vm0 = vcmp.le.f32.partialorder %v1567_v25, 0.7853982 }
 0x13d   : > { %v820_v3 = vsel %vm737_vm15, %v819_v53, %v818_v52  ;;  %v864_v46 = vor.u32 %v863_v49, %v862_v23  ;;  %v867_v16 = vor.u32 %v866_v42, %v865_v13  ;;  %v870_v12 = vor.u32 %v869_v58, %v868_v56 }
 0x13e   : > { %v823_v2 = vsel %vm3818_vm13, %v3642_v36, %v820_v3  ;;  %v1633_v10 = vsub.s32 0, %v3904_v40  ;;  %vm873_vm15 = vcmp.lt.s32.totalorder %v852_v63, 3  ;;  %vm874_vm12 = vcmp.lt.s32.totalorder %v852_v63, 4 }
 0x13f   : > { %2738 = vcosq.f32 %v823_v2  ;;  %v1653_v62 = vsub.s32 4, %v1629_v26  ;;  %v876_v60 = vsel %vm874_vm12, %v864_v46, 2102212464  ;;  %vm872_vm13 = vcmp.lt.s32.totalorder %v852_v63, 2 }
 0x140   : > { %2740 = vsinq.f32 %v823_v2  ;;  %v2479_v4 = vmin.u32 %v1633_v10, %v3904_v40  ;;  %v879_v19 = vsel %vm871_vm14, %v858_v7, %v861_v44  ;;  %v880_v25 = vsel %vm874_vm12, %v867_v16, 920167782 }
 0x141   : > { %v887_v28 = vshll.u32 %v847_v54, 8  ;;  %v875_v6 = vsel %vm871_vm14, %v855_v33, %v858_v7  ;;  %v877_v55 = vsel %vm873_vm15, %v861_v44, %v876_v60  ;;  %v883_v14 = vsel %vm871_vm14, %v861_v44, %v864_v46 }
 0x142   : > { %v1635_v11 = vclz %v2479_v4  ;;  %v1623_v30 = vadd.s32 %v3860_v18, %v3867_v9  ;;  %v881_v31 = vsel %vm873_vm15, %v864_v46, %v880_v25  ;;  %v884_v5 = vsel %vm874_vm12, %v870_v12, 1326507024 }
 0x143   : > { %v2482_v20 = vadd.s32 4294967169, %v1675_v1  ;;  %vm827_vm1 = vweird.f32 %v3642_v36  ;;  %v1654_v38 = vsel %vm1569_vm11, %v1653_v62, %v1629_v26  ;;  %v882_v50 = vsel %vm872_vm13, %v879_v19, %v881_v31 }
 0x144   : > { %v2480_v34 = vadd.s32 4294967294, %v1635_v11  ;;  %v885_v24 = vsel %vm873_vm15, %v867_v16, %v884_v5  ;;  %v878_v61 = vsel %vm872_vm13, %v875_v6, %v877_v55  ;;  %vm830_vm5 = vcmp.lt.s32.totalorder %v3891_v29, 2 }
 0x145   : > { %v886_v47 = vsel %vm872_vm13, %v883_v14, %v885_v24  ;;  %v3935_v54 = vmul.u32.u64.low %v887_v28, %v882_v50  ;;  %v3936_v18 = vmul.u32.u64.high %v887_v28, %v882_v50, %v3935_v54  ;;  %v1681_v17 = vadd.s32 1, %v2482_v20 }
 0x146   : > { %vm2481_vm3 = vcmp.lt.s32.totalorder %v2480_v34, 0  ;;  %v3939_v9 = vmul.u32.u64.low %v887_v28, %v886_v47  ;;  %v3940_v22 = vmul.u32.u64.high %v887_v28, %v886_v47, %v3939_v9  ;;  %vm834_vm6 = vcmp.eq.s32.totalorder %v3891_v29, 2 }
 0x147   : > { %v1638_v26 = vsel %vm2481_vm3, 0, %v2480_v34  ;;  %v1656_v52 = vsel %vm3915_vm0, 0, %v1654_v38  ;;  %vm1682_vm4 = vcmp.gt.s32.totalorder %v1681_v17, 0  ;;  %v894_v57 = vmul.u32 %v887_v28, %v878_v61 }
 0x148   : > { %v1639_v27 = vsub.s32 32, %v1638_v26  ;;  %v1640_v63 = vshll.u32 %v3904_v40, %v1638_v26  ;;  %v1643_v15 = vsub.s32 4294967266, %v1638_v26  ;;  %v897_v32 = vadd.s32 1, %v3936_v18 }
 0x149   : > { %v2739_v23 = vpop.eup %2738  ;;  %v1671_v13 = vand.u32 2147483647, %v3886_v21  ;;  %v1683_v56 = vsel %vm1682_vm4, %v1681_v17, 0  ;;  %vm831_vm8 = vcmp.eq.s32.totalorder %v3891_v29, 0  ;;  %v1660_v1 = vadd.s32 3, %v1656_v52 }
 0x14a   : > { %v2741_v53 = vpop.eup %2740  ;;  %v835_v59 = vxor.u32 2147483648, %v2739_v23  ;;  %v1641_v49 = vshrl.u32 %v1623_v30, %v1639_v27  ;;  %v1644_v42 = vadd.s32 127, %v1643_v15  ;;  %vm896_vm9 = vc.u32 %v3940_v22, %v3935_v54 }
 0x14b   : > { %v832_v58 = vxor.u32 2147483648, %v2741_v53  ;;  %v1685_v40 = vand.u32 31, %v1683_v56  ;;  %v898_v44 = vsel %vm896_vm9, %v897_v32, %v3936_v18  ;;  %v1678_v46 = vand.u32 8388607, %v1671_v13 }
 0x14c   : > { %v836_v3 = vsel %vm834_vm6, %v835_v59, %v2741_v53  ;;  %v1642_v33 = vor.u32 %v1641_v49, %v1640_v63  ;;  %v1645_v7 = vshll.u32 %v1644_v42, 23  ;;  %v899_v10 = vadd.s32 %v898_v44, %v894_v57 }
 0x14d   : > { %v833_v2 = vsel %vm831_vm8, %v2739_v23, %v832_v58  ;;  %v1686_v16 = vsub.s32 32, %v1685_v40  ;;  %v1684_v60 = vshrl.u32 %v1683_v56, 5  ;;  %v1688_v28 = vshll.u32 %v2798_v35, %v1685_v40 }
 0x14e   : > { %v837_v12 = vsel %vm830_vm5, %v833_v2, %v836_v3  ;;  %v1646_v4 = vor.u32 4788187, %v1645_v7  ;;  %v1649_v62 = vcvt.s32.f32 %v1642_v33  ;;  %v900_v25 = vadd.s32 536870912, %v899_v10  ;;  %v3995_v7 = vld [vmem:[%s2897_s10 + $0x38] sm:$0xff] }
 0x14f   : > { %v838_v19 = vsel %vm827_vm1, nan, %v837_v12  ;;  %v1691_v11 = vshll.u32 %v2799_v37, %v1685_v40  ;;  %v1689_v55 = vshrl.u32 %v2799_v37, %v1686_v16  ;;  %v1692_v14 = vshrl.u32 %v2800_v39, %v1686_v16 }
 0x150   : > { %2550 = vmatmul.mubr.msk.f32.gmra.mrb[4].mxu0 %vm1882_vm2, %v838_v19  ;;  %v1647_v6 = vand.u32 2147483647, %v1646_v4  ;;  %v1694_v29 = vshll.u32 %v2800_v39, %v1685_v40  ;;  %v901_v30 = vshrl.u32 %v900_v25, 30  ;;  %v1695_v31 = vshrl.u32 %v2801_v41, %v1686_v16 }
 0x151   : > { %v1697_v36 = vshll.u32 %v2801_v41, %v1685_v40  ;;  %v1698_v5 = vshrl.u32 %v2802_v43, %v1686_v16  ;;  %v1679_v34 = vor.u32 8388608, %v1678_v46  ;;  %v1700_v38 = vshll.u32 %v2802_v43, %v1685_v40 }
 0x152   : > { %v1650_v20 = vmul.f32 %v1649_v62, %v1647_v6  ;;  %v3972_v50 = vand.u32 3, %v1660_v1  ;;  %v902_v24 = vshll.u32 %v901_v30, 30  ;;  %v1687_v61 = vshrl.u32 %v2798_v35, %v1686_v16 }
 0x153   : > { %v1701_v47 = vshrl.u32 %v2803_v51, %v1686_v16  ;;  %v1690_v9 = vor.u32 %v1689_v55, %v1688_v28  ;;  %v1693_v17 = vor.u32 %v1692_v14, %v1691_v11  ;;  %v1699_v26 = vor.u32 %v1698_v5, %v1697_v36 }
 0x154   : > { %v1651_v18 = vxor.u32 2147483648, %v1650_v20  ;;  %v3976_v52 = vsub.s32 %v899_v10, %v902_v24  ;;  %v1696_v27 = vor.u32 %v1695_v31, %v1694_v29  ;;  %vm1703_vm7 = vcmp.lt.s32.totalorder %v1684_v60, 1  ;;  %v4027_v29 = vld [vmem:[%s2897_s10 + $0x78] sm:$0xff] }
 0x155   : > { %vm1706_vm10 = vcmp.lt.s32.totalorder %v1684_v60, 4  ;;  %v1702_v15 = vor.u32 %v1701_v47, %v1700_v38  ;;  %vm1705_vm14 = vcmp.lt.s32.totalorder %v1684_v60, 3  ;;  %v1719_v23 = vshll.u32 %v1679_v34, 8 }
 0x156   : > { %v1652_v63 = vsel %vm1569_vm11, %v1651_v18, %v1650_v20  ;;  %v905_v32 = vsub.s32 0, %v3976_v52  ;;  %vm1704_vm15 = vcmp.lt.s32.totalorder %v1684_v60, 2  ;;  %v1708_v56 = vsel %vm1706_vm10, %v1696_v27, 2102212464 }
 0x157   : > { %v1655_v57 = vsel %vm3915_vm0, %v3712_v45, %v1652_v63  ;;  %v925_v53 = vsub.s32 4, %v901_v30  ;;  %v1711_v59 = vsel %vm1703_vm7, %v1690_v9, %v1693_v17  ;;  %v1712_v49 = vsel %vm1706_vm10, %v1699_v26, 920167782 }
 0x158   : > { %2742 = vcosq.f32 %v1655_v57  ;;  %v2451_v42 = vmin.u32 %v905_v32, %v3976_v52  ;;  %v1707_v58 = vsel %vm1703_vm7, %v1687_v61, %v1690_v9  ;;  %v1713_v0 = vsel %vm1705_vm14, %v1696_v27, %v1712_v49 }
 0x159   : > { %2744 = vsinq.f32 %v1655_v57  ;;  %v1709_v1 = vsel %vm1705_vm14, %v1693_v17, %v1708_v56  ;;  %v1714_v40 = vsel %vm1704_vm15, %v1711_v59, %v1713_v0  ;;  %v1715_v3 = vsel %vm1703_vm7, %v1693_v17, %v1696_v27 }
 0x15a   : > { %v1716_v33 = vsel %vm1706_vm10, %v1702_v15, 1326507024  ;;  %vm3999_vm11 = vcmp.le.f32.partialorder %v839_v8, 0.7853982  ;;  %vm841_vm0 = vcmp.lt.s32.totalorder %v3830_v48, 0  ;;  %v907_v2 = vclz %v2451_v42 }
 0x15b   : > { %v943_v10 = vand.u32 2147483647, %v3995_v7  ;;  %v926_v46 = vsel %vm841_vm0, %v925_v53, %v901_v30  ;;  %v1717_v16 = vsel %vm1705_vm14, %v1699_v26, %v1716_v33  ;;  %vm1659_vm12 = vweird.f32 %v3712_v45 }
 0x15c   : > { %v4008_v12 = vmul.u32.u64.low %v1719_v23, %v1714_v40  ;;  %v4009_v4 = vmul.u32.u64.high %v1719_v23, %v1714_v40, %v4008_v12  ;;  %v2452_v8 = vadd.s32 4294967294, %v907_v2  ;;  %v1710_v62 = vsel %vm1704_vm15, %v1707_v58, %v1709_v1 }
 0x15d   : > { %v1718_v19 = vsel %vm1704_vm15, %v1715_v3, %v1717_v16  ;;  %v946_v25 = vand.u32 2139095040, %v3995_v7  ;;  %vm1662_vm13 = vcmp.lt.s32.totalorder %v3972_v50, 2  ;;  %vm1663_vm1 = vcmp.eq.s32.totalorder %v3972_v50, 0 }
 0x15e   : > { %v4017_v28 = vmul.u32.u64.low %v1719_v23, %v1718_v19  ;;  %v4018_v11 = vmul.u32.u64.high %v1719_v23, %v1718_v19, %v4017_v28  ;;  %v4020_v6 = vpop.f32.mrb[0].mxu0  ;;  %v895_v55 = vadd.s32 %v3935_v54, %v3940_v22  ;;  %vm2453_vm3 = vcmp.lt.s32.totalorder %v2452_v8, 0 }
 0x15f   : > { %v928_v14 = vsel %vm3999_vm11, 0, %v926_v46  ;;  %v947_v60 = vshrl.u32 %v946_v25, 23  ;;  %v4029_v30 = vpop.f32.mrb[1].mxu0  ;;  %v910_v31 = vsel %vm2453_vm3, 0, %v2452_v8  ;;  %v1726_v36 = vmul.u32 %v1719_v23, %v1710_v62 }
 0x160   : > { %v1729_v5 = vadd.s32 1, %v4009_v4  ;;  %v950_v20 = vand.u32 8388607, %v943_v10  ;;  %v911_v34 = vsub.s32 32, %v910_v31  ;;  %v912_v38 = vshll.u32 %v3976_v52, %v910_v31 }
 0x161   : > { %v915_v54 = vsub.s32 4294967266, %v910_v31  ;;  %v2454_v22 = vadd.s32 4294967169, %v947_v60  ;;  %vm1666_vm5 = vcmp.eq.s32.totalorder %v3972_v50, 2  ;;  %v932_v61 = vadd.s32 3, %v928_v14 }
 0x162   : > { %v2743_v24 = vpop.eup %2742  ;;  %vm1728_vm6 = vc.u32 %v4018_v11, %v4008_v12  ;;  %v1778_v47 = vand.u32 2139095040, %v4027_v29  ;;  %v913_v17 = vshrl.u32 %v895_v55, %v911_v34  ;;  %v1775_v52 = vand.u32 2147483647, %v4027_v29 }
 0x163   : > { %v2745_v18 = vpop.eup %2744  ;;  %v1667_v9 = vxor.u32 2147483648, %v2743_v24  ;;  %v916_v26 = vadd.s32 127, %v915_v54  ;;  %v1730_v27 = vsel %vm1728_vm6, %v1729_v5, %v4009_v4  ;;  %v953_v23 = vadd.s32 1, %v2454_v22 }
 0x164   : > { %v1664_v63 = vxor.u32 2147483648, %v2745_v18  ;;  %v1731_v15 = vadd.s32 %v1730_v27, %v1726_v36  ;;  %v914_v32 = vor.u32 %v913_v17, %v912_v38  ;;  %v951_v53 = vor.u32 8388608, %v950_v20  ;;  %v4165_v36 = vld [vmem:[%s4602_s2 + $0x2] ss:$0 sm:$0xff] }
 0x165   : > { %v1668_v57 = vsel %vm1666_vm5, %v1667_v9, %v2745_v18  ;;  %v917_v56 = vshll.u32 %v916_v26, 23  ;;  %vm954_vm4 = vcmp.gt.s32.totalorder %v953_v23, 0  ;;  %v1779_v42 = vshrl.u32 %v1778_v47, 23 }
 0x166   : > { %v1665_v59 = vsel %vm1663_vm1, %v2743_v24, %v1664_v63  ;;  %v1732_v49 = vadd.s32 536870912, %v1731_v15  ;;  %v921_v1 = vcvt.s32.f32 %v914_v32  ;;  %v955_v40 = vsel %vm954_vm4, %v953_v23, 0 }
 0x167   : > { %v1669_v58 = vsel %vm1662_vm13, %v1665_v59, %v1668_v57  ;;  %v918_v0 = vor.u32 4788187, %v917_v56  ;;  %v957_v2 = vand.u32 31, %v955_v40  ;;  %v4047_v16 = vand.u32 3, %v932_v61 }
 0x168   : > { %v1670_v3 = vsel %vm1659_vm12, nan, %v1669_v58  ;;  %v1733_v33 = vshrl.u32 %v1732_v49, 30  ;;  %vm1673_vm8 = vcmp.lt.s32.totalorder %v3886_v21, 0  ;;  %v4051_v4 = vadd.s32 %v4008_v12, %v4018_v11 }
 0x169   : > { %2562 = vmatmul.mubr.msk.f32.gmra.mrb[4].mxu1 %vm1882_vm2, %v1670_v3  ;;  %v919_v46 = vand.u32 2147483647, %v918_v0  ;;  %v958_v8 = vsub.s32 32, %v957_v2  ;;  %v4053_v62 = vshll.u32 %v951_v53, 8  ;;  %v2486_v19 = vadd.s32 4294967169, %v1779_v42 }
 0x16a   : > { %v1734_v50 = vshll.u32 %v1733_v33, 30  ;;  %v956_v45 = vshrl.u32 %v955_v40, 5  ;;  %v960_v28 = vshll.u32 %v2798_v35, %v957_v2  ;;  %v4058_v55 = vand.u32 8388607, %v1775_v52 }
 0x16b   : > { %v922_v25 = vmul.f32 %v921_v1, %v919_v46  ;;  %v961_v60 = vshrl.u32 %v2799_v37, %v958_v8  ;;  %v963_v12 = vshll.u32 %v2799_v37, %v957_v2  ;;  %v966_v11 = vshll.u32 %v2800_v39, %v957_v2 }
 0x16c   : > { %v4060_v14 = vsub.s32 %v1731_v15, %v1734_v50  ;;  %vm4067_vm9 = vcmp.le.f32.partialorder %v1671_v13, 0.7853982  ;;  %v964_v5 = vshrl.u32 %v2800_v39, %v958_v8  ;;  %v967_v20 = vshrl.u32 %v2801_v41, %v958_v8 }
 0x16d   : > { %v923_v31 = vxor.u32 2147483648, %v922_v25  ;;  %v969_v34 = vshll.u32 %v2801_v41, %v957_v2  ;;  %v1757_v54 = vsub.s32 4, %v1733_v33  ;;  %v970_v22 = vshrl.u32 %v2802_v43, %v958_v8 }
 0x16e   : > { %v1737_v38 = vsub.s32 0, %v4060_v14  ;;  %v1785_v24 = vadd.s32 1, %v2486_v19  ;;  %v959_v13 = vshrl.u32 %v2798_v35, %v958_v8  ;;  %v962_v47 = vor.u32 %v961_v60, %v960_v28 }
 0x16f   : > { %v924_v61 = vsel %vm841_vm0, %v923_v31, %v922_v25  ;;  %v972_v18 = vshll.u32 %v2802_v43, %v957_v2  ;;  %v965_v26 = vor.u32 %v964_v5, %v963_v12  ;;  %v968_v27 = vor.u32 %v967_v20, %v966_v11 }
 0x170   : > { %v927_v9 = vsel %vm3999_vm11, %v3830_v48, %v924_v61  ;;  %v2483_v17 = vmin.u32 %v1737_v38, %v4060_v14  ;;  %v971_v63 = vor.u32 %v970_v22, %v969_v34  ;;  %v973_v15 = vshrl.u32 %v2803_v51, %v958_v8 }
 0x171   : > { %2746 = vcosq.f32 %v927_v9  ;;  %vm975_vm7 = vcmp.lt.s32.totalorder %v956_v45, 1  ;;  %v1758_v57 = vsel %vm1673_vm8, %v1757_v54, %v1733_v33  ;;  %vm1786_vm10 = vcmp.gt.s32.totalorder %v1785_v24, 0 }
 0x172   : > { %2748 = vsinq.f32 %v927_v9  ;;  %v1739_v23 = vclz %v2483_v17  ;;  %v974_v32 = vor.u32 %v973_v15, %v972_v18  ;;  %vm976_vm14 = vcmp.lt.s32.totalorder %v956_v45, 2 }
 0x173   : > { %vm977_vm15 = vcmp.lt.s32.totalorder %v956_v45, 3  ;;  %vm978_vm0 = vcmp.lt.s32.totalorder %v956_v45, 4  ;;  %v979_v56 = vsel %vm975_vm7, %v959_v13, %v962_v47  ;;  %v983_v59 = vsel %vm975_vm7, %v962_v47, %v965_v26 }
 0x174   : > { %v2484_v44 = vadd.s32 4294967294, %v1739_v23  ;;  %v980_v53 = vsel %vm978_vm0, %v968_v27, 2102212464  ;;  %v984_v42 = vsel %vm978_vm0, %v971_v63, 920167782  ;;  %v987_v58 = vsel %vm975_vm7, %v965_v26, %v968_v27 }
 0x175   : > { %v981_v49 = vsel %vm977_vm15, %v965_v26, %v980_v53  ;;  %v988_v0 = vsel %vm978_vm0, %v974_v32, 1326507024  ;;  %vm931_vm11 = vweird.f32 %v3830_v48  ;;  %v1760_v40 = vsel %vm4067_vm9, 0, %v1758_v57 }
 0x176   : > { %v4087_v1 = vpop.f32.mrb[0].mxu1  ;;  %vm2485_vm12 = vcmp.lt.s32.totalorder %v2484_v44, 0  ;;  %v985_v3 = vsel %vm977_vm15, %v968_v27, %v984_v42  ;;  %v989_v33 = vsel %vm977_vm15, %v971_v63, %v988_v0  ;;  %v982_v50 = vsel %vm976_vm14, %v979_v56, %v981_v49 }
 0x177   : > { %v4092_v2 = vpop.f32.mrb[1].mxu1  ;;  %v1742_v46 = vsel %vm2485_vm12, 0, %v2484_v44  ;;  %v986_v8 = vsel %vm976_vm14, %v983_v59, %v985_v3  ;;  %v990_v19 = vsel %vm976_vm14, %v987_v58, %v989_v33  ;;  %v1787_v12 = vsel %vm1786_vm10, %v1785_v24, 0 }
 0x178   : > { %v1743_v25 = vsub.s32 32, %v1742_v46  ;;  %v1744_v28 = vshll.u32 %v4060_v14, %v1742_v46  ;;  %v1747_v60 = vsub.s32 4294967266, %v1742_v46  ;;  %v1764_v45 = vadd.s32 3, %v1760_v40 }
 0x179   : > { %v4100_v11 = vmul.u32.u64.low %v4053_v62, %v990_v19  ;;  %v4101_v31 = vmul.u32.u64.high %v4053_v62, %v990_v19, %v4100_v11  ;;  %v4104_v5 = vmul.u32.u64.low %v4053_v62, %v986_v8  ;;  %v4105_v20 = vmul.u32.u64.high %v4053_v62, %v986_v8, %v4104_v5 }
 0x17a   : > { %v1745_v34 = vshrl.u32 %v4051_v4, %v1743_v25  ;;  %v1748_v38 = vadd.s32 127, %v1747_v60  ;;  %v1789_v54 = vand.u32 31, %v1787_v12  ;;  %vm934_vm13 = vcmp.lt.s32.totalorder %v4047_v16, 2 }
 0x17b   : > { %v2747_v22 = vpop.eup %2746  ;;  %vm935_vm1 = vcmp.eq.s32.totalorder %v4047_v16, 0  ;;  %vm938_vm3 = vcmp.eq.s32.totalorder %v4047_v16, 2  ;;  %v998_v14 = vmul.u32 %v4053_v62, %v982_v50  ;;  %vm1000_vm5 = vc.u32 %v4101_v31, %v4104_v5 }
 0x17c   : > { %v2749_v24 = vpop.eup %2748  ;;  %v939_v61 = vxor.u32 2147483648, %v2747_v22  ;;  %v1746_v13 = vor.u32 %v1745_v34, %v1744_v28  ;;  %v1749_v47 = vshll.u32 %v1748_v38, 23  ;;  %v1790_v18 = vsub.s32 32, %v1789_v54 }
 0x17d   : > { %v936_v9 = vxor.u32 2147483648, %v2749_v24  ;;  %v1001_v4 = vadd.s32 1, %v4105_v20  ;;  %v1783_v17 = vor.u32 8388608, %v4058_v55  ;;  %v4117_v15 = vand.u32 3, %v1764_v45 }
 0x17e   : > { %v940_v26 = vsel %vm938_vm3, %v939_v61, %v2749_v24  ;;  %v1750_v27 = vor.u32 4788187, %v1749_v47  ;;  %v1753_v63 = vcvt.s32.f32 %v1746_v13  ;;  %v1792_v57 = vshll.u32 %v2798_v35, %v1789_v54  ;;  %v4180_v24 = vld [vmem:[%s4602_s2 + $0x4] ss:$0 sm:$0xff] }
 0x17f   : > { %v937_v62 = vsel %vm935_vm1, %v2747_v22, %v936_v9  ;;  %v1002_v23 = vsel %vm1000_vm5, %v1001_v4, %v4105_v20  ;;  %v1793_v32 = vshrl.u32 %v2799_v37, %v1790_v18  ;;  %v1795_v55 = vshll.u32 %v2799_v37, %v1789_v54  ;;  %v4156_v20 = vld [vmem:[%s4602_s2 + $0x1] ss:$0 sm:$0xff]  ;;  %v4190_v9 = vld [vmem:[%s4602_s2 + $0x5] ss:$0 sm:$0xff] }
 0x180   : > { %v941_v44 = vsel %vm934_vm13, %v937_v62, %v940_v26  ;;  %v1751_v56 = vand.u32 2147483647, %v1750_v27  ;;  %v1003_v53 = vadd.s32 %v1002_v23, %v998_v14  ;;  %v1788_v49 = vshrl.u32 %v1787_v12, 5 }
 0x181   : > { %v942_v59 = vsel %vm931_vm11, nan, %v941_v44  ;;  %v1796_v42 = vshrl.u32 %v2800_v39, %v1790_v18  ;;  %v1798_v58 = vshll.u32 %v2800_v39, %v1789_v54  ;;  %v1799_v3 = vshrl.u32 %v2801_v41, %v1790_v18 }
 0x182   : > { %2552 = vmatprep.mubr.msk.f32.mxu0 %vm1882_vm2, %v942_v59  ;;  %v1754_v0 = vmul.f32 %v1753_v63, %v1751_v56  ;;  %v1004_v40 = vadd.s32 536870912, %v1003_v53  ;;  %v1801_v16 = vshll.u32 %v2801_v41, %v1789_v54  ;;  %v1791_v33 = vshrl.u32 %v2798_v35, %v1790_v18 }
 0x183   : > { %v1802_v37 = vshrl.u32 %v2802_v43, %v1790_v18  ;;  %v1804_v48 = vshll.u32 %v2802_v43, %v1789_v54  ;;  %v1805_v46 = vshrl.u32 %v2803_v51, %v1790_v18  ;;  %v1794_v39 = vor.u32 %v1793_v32, %v1792_v57  ;;  %v4146_v43 = vld [vmem:[%s4602_s2] ss:$0 sm:$0xff]  ;;  %v4170_v54 = vld [vmem:[%s4602_s2 + $0x3] ss:$0 sm:$0xff] }
 0x184   : > { %v1755_v50 = vxor.u32 2147483648, %v1754_v0  ;;  %v4138_v8 = vshrl.u32 %v1004_v40, 30  ;;  %v1797_v19 = vor.u32 %v1796_v42, %v1795_v55  ;;  %v1800_v25 = vor.u32 %v1799_v3, %v1798_v58 }
 0x185   : > { %v1803_v28 = vor.u32 %v1802_v37, %v1801_v16  ;;  %v1806_v60 = vor.u32 %v1805_v46, %v1804_v48  ;;  %vm1807_vm6 = vcmp.lt.s32.totalorder %v1788_v49, 1  ;;  %vm1808_vm4 = vcmp.lt.s32.totalorder %v1788_v49, 2 }
 0x186   : > { %v1756_v41 = vsel %vm1673_vm8, %v1755_v50, %v1754_v0  ;;  %v1006_v35 = vshll.u32 %v4138_v8, 30  ;;  %vm1810_vm7 = vcmp.lt.s32.totalorder %v1788_v49, 4  ;;  %vm1809_vm10 = vcmp.lt.s32.totalorder %v1788_v49, 3 }
 0x187   : > { %v1759_v51 = vsel %vm4067_vm9, %v3886_v21, %v1756_v41  ;;  %v1811_v12 = vsel %vm1807_vm6, %v1791_v33, %v1794_v39  ;;  %v1812_v11 = vsel %vm1810_vm7, %v1800_v25, 2102212464  ;;  %v1815_v45 = vsel %vm1807_vm6, %v1794_v39, %v1797_v19 }
 0x188   : > { %2750 = vcosq.f32 %v1759_v51  ;;  %v4158_v34 = vsub.s32 %v1003_v53, %v1006_v35  ;;  %v1813_v38 = vsel %vm1809_vm10, %v1797_v19, %v1812_v11  ;;  %v1816_v22 = vsel %vm1810_vm7, %v1803_v28, 920167782 }
 0x189   : > { %2752 = vsinq.f32 %v1759_v51  ;;  %v4173_v14 = vshll.u32 %v1783_v17, 8  ;;  %v2123_v61 = vadd.f32 %v4020_v6, %v4146_v43  ;;  %v1817_v47 = vsel %vm1809_vm10, %v1800_v25, %v1816_v22 }
 0x18a   : > { %v1009_v13 = vsub.s32 0, %v4158_v34  ;;  %v1819_v18 = vsel %vm1807_vm6, %v1797_v19, %v1800_v25  ;;  %v2139_v4 = vadd.f32 %v4020_v6, %v4156_v20  ;;  %v4195_v17 = vsel %vm1808_vm4, %v1811_v12, %v1813_v38 }
 0x18b   : > { %v1818_v26 = vsel %vm1808_vm4, %v1815_v45, %v1817_v47  ;;  %v1820_v27 = vsel %vm1810_vm7, %v1806_v60, 1326507024  ;;  %v2155_v63 = vadd.f32 %v4020_v6, %v4165_v36  ;;  %vm1766_vm8 = vcmp.lt.s32.totalorder %v4117_v15, 2 }
 0x18c   : > { %v2455_v62 = vmin.u32 %v1009_v13, %v4158_v34  ;;  %v1821_v23 = vsel %vm1809_vm10, %v1803_v28, %v1820_v27  ;;  %v2171_v57 = vadd.f32 %v4020_v6, %v4170_v54  ;;  %v2187_v32 = vadd.f32 %v4020_v6, %v4180_v24 }
 0x18d   : > { %vm1763_vm9 = vweird.f32 %v3886_v21  ;;  %v1822_v44 = vsel %vm1808_vm4, %v1819_v18, %v1821_v23  ;;  %v4211_v56 = vmul.u32.u64.low %v4173_v14, %v1818_v26  ;;  %v4212_v53 = vmul.u32.u64.high %v4173_v14, %v1818_v26, %v4211_v56 }
 0x18e   : > { %v2203_v55 = vadd.f32 %v4020_v6, %v4190_v9  ;;  %vm1770_vm14 = vcmp.eq.s32.totalorder %v4117_v15, 2  ;;  %v999_v59 = vadd.s32 %v4104_v5, %v4101_v31  ;;  %v1011_v42 = vclz %v2455_v62 }
 0x18f   : > { %v1830_v58 = vmul.u32 %v4173_v14, %v4195_v17  ;;  %v4223_v49 = vmul.u32.u64.low %v4173_v14, %v1822_v44  ;;  %v4224_v0 = vmul.u32.u64.high %v4173_v14, %v1822_v44, %v4223_v49  ;;  %vm2218_vm15 = vcmask 261120  }
 0x190   : > { %v2131_v40 = vadd.f32 %v4087_v1, %v4146_v43  ;;  %v2456_v3 = vadd.s32 4294967294, %v1011_v42  ;;  %2220 = vst.msk [vmem:[%s4228_s7 + $0x8] sm:$0xff] %vm2218_vm15, %v2123_v61  ;;  %2236 = vst.msk [vmem:[%s4228_s7 + $0x88] sm:$0xff] %vm2218_vm15, %v2139_v4  ;;  %v2147_v6 = vadd.f32 %v4087_v1, %v4156_v20  ;;  %v2163_v31 = vadd.f32 %v4087_v1, %v4165_v36 }
 0x191   : > { %2252 = vst.msk [vmem:[%s4228_s7 + $0x108] sm:$0xff] %vm2218_vm15, %v2155_v63  ;;  %2268 = vst.msk [vmem:[%s4228_s7 + $0x188] sm:$0xff] %vm2218_vm15, %v2171_v57  ;;  %v2179_v5 = vadd.f32 %v4087_v1, %v4170_v54  ;;  %v1833_v16 = vadd.s32 1, %v4212_v53  ;;  %v2195_v33 = vadd.f32 %v4087_v1, %v4180_v24  ;;  %v2211_v37 = vadd.f32 %v4087_v1, %v4190_v9 }
 0x192   : > { %2284 = vst.msk [vmem:[%s4228_s7 + $0x208] sm:$0xff] %vm2218_vm15, %v2187_v32  ;;  %2300 = vst.msk [vmem:[%s4228_s7 + $0x288] sm:$0xff] %vm2218_vm15, %v2203_v55  ;;  %v2122_v48 = vadd.f32 %v4146_v43, %v4029_v30  ;;  %v2751_v46 = vpop.eup %2750  ;;  %vm2457_vm0 = vcmp.lt.s32.totalorder %v2456_v3, 0  ;;  %v2138_v1 = vadd.f32 %v4156_v20, %v4029_v30  ;;  %v2154_v50 = vadd.f32 %v4165_v36, %v4029_v30 }
 0x193   : > { %2228 = vst.msk [vmem:[%s4228_s7 + $0x48] sm:$0xff] %vm2218_vm15, %v2131_v40  ;;  %2244 = vst.msk [vmem:[%s4228_s7 + $0xc8] sm:$0xff] %vm2218_vm15, %v2147_v6  ;;  %v2170_v39 = vadd.f32 %v4170_v54, %v4029_v30  ;;  %v2753_v19 = vpop.eup %2752  ;;  %vm1767_vm11 = vcmp.eq.s32.totalorder %v4117_v15, 0  ;;  %v1771_v25 = vxor.u32 2147483648, %v2751_v46  ;;  %v1014_v28 = vsel %vm2457_vm0, 0, %v2456_v3 }
 0x194   : > { %2260 = vst.msk [vmem:[%s4228_s7 + $0x148] sm:$0xff] %vm2218_vm15, %v2163_v31  ;;  %2276 = vst.msk [vmem:[%s4228_s7 + $0x1c8] sm:$0xff] %vm2218_vm15, %v2179_v5  ;;  %vm1832_vm12 = vc.u32 %v4224_v0, %v4211_v56  ;;  %v1768_v60 = vxor.u32 2147483648, %v2753_v19  ;;  %v1015_v41 = vsub.s32 32, %v1014_v28  ;;  %v1016_v35 = vshll.u32 %v4158_v34, %v1014_v28 }
 0x195   : > { %2292 = vst.msk [vmem:[%s4228_s7 + $0x248] sm:$0xff] %vm2218_vm15, %v2195_v33  ;;  %2308 = vst.msk [vmem:[%s4228_s7 + $0x2c8] sm:$0xff] %vm2218_vm15, %v2211_v37  ;;  %v1019_v51 = vsub.s32 4294967266, %v1014_v28  ;;  %v1772_v12 = vsel %vm1770_vm14, %v1771_v25, %v2753_v19  ;;  %v1834_v11 = vsel %vm1832_vm12, %v1833_v16, %v4212_v53  ;;  %v2186_v38 = vadd.f32 %v4180_v24, %v4029_v30 }
 0x196   : > { %2219 = vst.msk [vmem:[%s4228_s7] sm:$0xff] %vm2218_vm15, %v2122_v48  ;;  %2235 = vst.msk [vmem:[%s4228_s7 + $0x80] sm:$0xff] %vm2218_vm15, %v2138_v1  ;;  %v2202_v45 = vadd.f32 %v4190_v9, %v4029_v30  ;;  %v1769_v34 = vsel %vm1767_vm11, %v2751_v46, %v1768_v60  ;;  %v1017_v22 = vshrl.u32 %v999_v59, %v1015_v41  ;;  %v1029_v44 = vsub.s32 4, %v4138_v8 }
 0x197   : > { %2251 = vst.msk [vmem:[%s4228_s7 + $0x100] sm:$0xff] %vm2218_vm15, %v2154_v50  ;;  %2267 = vst.msk [vmem:[%s4228_s7 + $0x180] sm:$0xff] %vm2218_vm15, %v2170_v39  ;;  %v1020_v14 = vadd.s32 127, %v1019_v51  ;;  %v1835_v61 = vadd.s32 %v1834_v11, %v1830_v58  ;;  %v1773_v13 = vsel %vm1766_vm8, %v1769_v34, %v1772_v12  ;;  %v2130_v47 = vadd.f32 %v4146_v43, %v4092_v2 }
 0x198   : > { %2283 = vst.msk [vmem:[%s4228_s7 + $0x200] sm:$0xff] %vm2218_vm15, %v2186_v38  ;;  %2299 = vst.msk [vmem:[%s4228_s7 + $0x280] sm:$0xff] %vm2218_vm15, %v2202_v45  ;;  %v2146_v30 = vadd.f32 %v4156_v20, %v4092_v2  ;;  %v2162_v18 = vadd.f32 %v4165_v36, %v4092_v2  ;;  %v1774_v15 = vsel %vm1763_vm9, nan, %v1773_v13  ;;  %v1018_v4 = vor.u32 %v1017_v22, %v1016_v35 }
 0x199   : > { %v1021_v17 = vshll.u32 %v1020_v14, 23  ;;  %v1836_v26 = vadd.s32 536870912, %v1835_v61  ;;  %2564 = vmatprep.mubr.msk.f32.mxu1 %vm1882_vm2, %v1774_v15  ;;  %v2178_v27 = vadd.f32 %v4170_v54, %v4092_v2  ;;  %v2194_v63 = vadd.f32 %v4180_v24, %v4092_v2  ;;  %2227 = vst.msk [vmem:[%s4228_s7 + $0x40] sm:$0xff] %vm2218_vm15, %v2130_v47 }
 0x19a   : > { %v2210_v62 = vadd.f32 %v4190_v9, %v4092_v2  ;;  %2243 = vst.msk [vmem:[%s4228_s7 + $0xc0] sm:$0xff] %vm2218_vm15, %v2146_v30  ;;  %2259 = vst.msk [vmem:[%s4228_s7 + $0x140] sm:$0xff] %vm2218_vm15, %v2162_v18  ;;  %v1025_v23 = vcvt.s32.f32 %v1018_v4  ;;  %vm945_vm13 = vcmp.lt.s32.totalorder %v3995_v7, 0  ;;  %vm944_vm1 = vcmp.le.f32.partialorder %v943_v10, 0.7853982 }
 0x19b   : > { %v1022_v21 = vor.u32 4788187, %v1021_v17  ;;  %v1837_v57 = vshrl.u32 %v1836_v26, 30  ;;  %2275 = vst.msk [vmem:[%s4228_s7 + $0x1c0] sm:$0xff] %vm2218_vm15, %v2178_v27  ;;  %2291 = vst.msk [vmem:[%s4228_s7 + $0x240] sm:$0xff] %vm2218_vm15, %v2194_v63  ;;  %v1030_v42 = vsel %vm945_vm13, %v1029_v44, %v4138_v8  ;;  %v1831_v33 = vadd.s32 %v4211_v56, %v4224_v0 }
 0x19c   : > { %2307 = vst.msk [vmem:[%s4228_s7 + $0x2c0] sm:$0xff] %vm2218_vm15, %v2210_v62  ;;  %v1032_v6 = vsel %vm944_vm1, 0, %v1030_v42  ;;  %vm1035_vm7 = vweird.f32 %v3995_v7  ;;  %vm1777_vm10 = vcmp.lt.s32.totalorder %v4027_v29, 0  ;;  %vm1776_vm8 = vcmp.le.f32.partialorder %v1775_v52, 0.7853982 }
 0x19d   : > { %v1023_v32 = vand.u32 2147483647, %v1022_v21  ;;  %v1838_v53 = vshll.u32 %v1837_v57, 30  ;;  %v1036_v5 = vadd.s32 3, %v1032_v6  ;;  %v1861_v0 = vsub.s32 4, %v1837_v57 }
 0x19e   : > { %vm1867_vm11 = vweird.f32 %v4027_v29 }
 0x19f   : > { %v1026_v2 = vmul.f32 %v1025_v23, %v1023_v32  ;;  %v1839_v55 = vsub.s32 %v1835_v61, %v1838_v53  ;;  %v1037_v10 = vand.u32 3, %v1036_v5  ;;  %v1862_v22 = vsel %vm1777_vm10, %v1861_v0, %v1837_v57 }
 0x1a0   : > { %v1864_v13 = vsel %vm1776_vm8, 0, %v1862_v22 }
 0x1a1   : > { %v1027_v59 = vxor.u32 2147483648, %v1026_v2  ;;  %v1841_v58 = vsub.s32 0, %v1839_v55  ;;  %vm1042_vm5 = vcmp.eq.s32.totalorder %v1037_v10, 2  ;;  %vm1039_vm6 = vcmp.eq.s32.totalorder %v1037_v10, 0 }
 0x1a2   : > { %vm1038_vm4 = vcmp.lt.s32.totalorder %v1037_v10, 2  ;;  %v1868_v47 = vadd.s32 3, %v1864_v13 }
 0x1a3   : > { %v1028_v49 = vsel %vm945_vm13, %v1027_v59, %v1026_v2  ;;  %v2487_v40 = vmin.u32 %v1841_v58, %v1839_v55 }
 0x1a4   : > { %v1031_v3 = vsel %vm944_vm1, %v3995_v7, %v1028_v49  ;;  %v1869_v30 = vand.u32 3, %v1868_v47 }
 0x1a5   : > { %2754 = vcosq.f32 %v1031_v3  ;;  %v1843_v31 = vclz %v2487_v40 }
 0x1a6   : > { %2756 = vsinq.f32 %v1031_v3  ;;  %vm1870_vm9 = vcmp.lt.s32.totalorder %v1869_v30, 2  ;;  %vm1871_vm14 = vcmp.eq.s32.totalorder %v1869_v30, 0  ;;  %vm1874_vm0 = vcmp.eq.s32.totalorder %v1869_v30, 2 }
 0x1a7   : > { %v2488_v16 = vadd.s32 4294967294, %v1843_v31 }
 0x1a9   : > { %vm2489_vm3 = vcmp.lt.s32.totalorder %v2488_v16, 0 }
 0x1aa   : > { %v1846_v37 = vsel %vm2489_vm3, 0, %v2488_v16 }
 0x1ab   : > { %v1847_v48 = vsub.s32 32, %v1846_v37  ;;  %v1848_v46 = vshll.u32 %v1839_v55, %v1846_v37  ;;  %v1851_v8 = vsub.s32 4294967266, %v1846_v37 }
 0x1ad   : > { %v1849_v1 = vshrl.u32 %v1831_v33, %v1847_v48  ;;  %v1852_v50 = vadd.s32 127, %v1851_v8 }
 0x1af   : > { %v2755_v39 = vpop.eup %2754  ;;  %v1850_v19 = vor.u32 %v1849_v1, %v1848_v46  ;;  %v1853_v25 = vshll.u32 %v1852_v50, 23 }
 0x1b0   : > { %v2757_v28 = vpop.eup %2756  ;;  %v1043_v60 = vxor.u32 2147483648, %v2755_v39 }
 0x1b1   : > { %v1040_v41 = vxor.u32 2147483648, %v2757_v28  ;;  %v1854_v35 = vor.u32 4788187, %v1853_v25  ;;  %v1857_v51 = vcvt.s32.f32 %v1850_v19 }
 0x1b2   : > { %v1044_v56 = vsel %vm1042_vm5, %v1043_v60, %v2757_v28 }
 0x1b3   : > { %v1041_v12 = vsel %vm1039_vm6, %v2755_v39, %v1040_v41  ;;  %v1855_v11 = vand.u32 2147483647, %v1854_v35 }
 0x1b4   : > { %v1045_v38 = vsel %vm1038_vm4, %v1041_v12, %v1044_v56 }
 0x1b5   : > { %v1046_v45 = vsel %vm1035_vm7, nan, %v1045_v38  ;;  %v1858_v34 = vmul.f32 %v1857_v51, %v1855_v11 }
 0x1b6   : > { %2553 = vmatmul.mubr.msk.f32.gmra.mrb[6].mxu0 %vm1882_vm2, %v1046_v45 }
 0x1b7   : > { %v1859_v14 = vxor.u32 2147483648, %v1858_v34 }
 0x1b9   : > { %v1860_v61 = vsel %vm1777_vm10, %v1859_v14, %v1858_v34 }
 0x1ba   : > { %v1863_v7 = vsel %vm1776_vm8, %v4027_v29, %v1860_v61 }
 0x1bb   : > { %2758 = vcosq.f32 %v1863_v7 }
 0x1bc   : > { %2760 = vsinq.f32 %v1863_v7 }
 0x1c3   : > { %v2548_v18 = vpop.f32.mrb[2].mxu0 }
 0x1c4   : > { %v2125_v52 = vadd.f32 %v2548_v18, %v4146_v43  ;;  %v2141_v4 = vadd.f32 %v2548_v18, %v4156_v20  ;;  %v2157_v17 = vadd.f32 %v2548_v18, %v4165_v36  ;;  %v2173_v26 = vadd.f32 %v2548_v18, %v4170_v54  ;;  %v2011_v27 = vpop.f32.mrb[3].mxu0 }
 0x1c5   : > { %v2759_v15 = vpop.eup %2758  ;;  %v2189_v21 = vadd.f32 %v2548_v18, %v4180_v24  ;;  %v2205_v23 = vadd.f32 %v2548_v18, %v4190_v9  ;;  %v2124_v57 = vadd.f32 %v4146_v43, %v2011_v27  ;;  %v2140_v44 = vadd.f32 %v4156_v20, %v2011_v27 }
 0x1c6   : > { %v2761_v63 = vpop.eup %2760  ;;  %v1875_v62 = vxor.u32 2147483648, %v2759_v15  ;;  %2222 = vst.msk [vmem:[%s4228_s7 + $0x18] sm:$0xff] %vm2218_vm15, %v2125_v52  ;;  %2238 = vst.msk [vmem:[%s4228_s7 + $0x98] sm:$0xff] %vm2218_vm15, %v2141_v4  ;;  %v2156_v53 = vadd.f32 %v4165_v36, %v2011_v27  ;;  %v2172_v2 = vadd.f32 %v4170_v54, %v2011_v27  ;;  %v2188_v59 = vadd.f32 %v4180_v24, %v2011_v27 }
 0x1c7   : > { %v1872_v32 = vxor.u32 2147483648, %v2761_v63  ;;  %2254 = vst.msk [vmem:[%s4228_s7 + $0x118] sm:$0xff] %vm2218_vm15, %v2157_v17  ;;  %2270 = vst.msk [vmem:[%s4228_s7 + $0x198] sm:$0xff] %vm2218_vm15, %v2173_v26  ;;  %v2204_v42 = vadd.f32 %v4190_v9, %v2011_v27 }
 0x1c8   : > { %v1876_v55 = vsel %vm1874_vm0, %v1875_v62, %v2761_v63  ;;  %2286 = vst.msk [vmem:[%s4228_s7 + $0x218] sm:$0xff] %vm2218_vm15, %v2189_v21  ;;  %2302 = vst.msk [vmem:[%s4228_s7 + $0x298] sm:$0xff] %vm2218_vm15, %v2205_v23 }
 0x1c9   : > { %2221 = vst.msk [vmem:[%s4228_s7 + $0x10] sm:$0xff] %vm2218_vm15, %v2124_v57  ;;  %v1873_v58 = vsel %vm1871_vm14, %v2759_v15, %v1872_v32  ;;  %2237 = vst.msk [vmem:[%s4228_s7 + $0x90] sm:$0xff] %vm2218_vm15, %v2140_v44 }
 0x1ca   : > { %2253 = vst.msk [vmem:[%s4228_s7 + $0x110] sm:$0xff] %vm2218_vm15, %v2156_v53  ;;  %2269 = vst.msk [vmem:[%s4228_s7 + $0x190] sm:$0xff] %vm2218_vm15, %v2172_v2  ;;  %v1877_v29 = vsel %vm1870_vm9, %v1873_v58, %v1876_v55 }
 0x1cb   : > { %2285 = vst.msk [vmem:[%s4228_s7 + $0x210] sm:$0xff] %vm2218_vm15, %v2188_v59  ;;  %2301 = vst.msk [vmem:[%s4228_s7 + $0x290] sm:$0xff] %vm2218_vm15, %v2204_v42  ;;  %v1878_v49 = vsel %vm1867_vm11, nan, %v1877_v29 }
 0x1cc   : > { %2565 = vmatmul.mubr.msk.f32.gmra.mrb[6].mxu1 %vm1882_vm2, %v1878_v49 }
 0x1da   : > { %v2560_v40 = vpop.f32.mrb[2].mxu1 }
 0x1db   : > { %v2133_v3 = vadd.f32 %v2560_v40, %v4146_v43  ;;  %v2149_v6 = vadd.f32 %v2560_v40, %v4156_v20  ;;  %v2165_v31 = vadd.f32 %v2560_v40, %v4165_v36  ;;  %v2181_v5 = vadd.f32 %v2560_v40, %v4170_v54  ;;  %v2051_v16 = vpop.f32.mrb[3].mxu1 }
 0x1dc   : > { %v2197_v33 = vadd.f32 %v2560_v40, %v4180_v24  ;;  %v2213_v37 = vadd.f32 %v2560_v40, %v4190_v9  ;;  %v2132_v10 = vadd.f32 %v4146_v43, %v2051_v16  ;;  %v2148_v48 = vadd.f32 %v4156_v20, %v2051_v16 }
 0x1dd   : > { %2230 = vst.msk [vmem:[%s4228_s7 + $0x58] sm:$0xff] %vm2218_vm15, %v2133_v3  ;;  %2246 = vst.msk [vmem:[%s4228_s7 + $0xd8] sm:$0xff] %vm2218_vm15, %v2149_v6  ;;  %v2164_v46 = vadd.f32 %v4165_v36, %v2051_v16  ;;  %v2180_v8 = vadd.f32 %v4170_v54, %v2051_v16  ;;  %v2196_v1 = vadd.f32 %v4180_v24, %v2051_v16 }
 0x1de   : > { %2262 = vst.msk [vmem:[%s4228_s7 + $0x158] sm:$0xff] %vm2218_vm15, %v2165_v31  ;;  %2278 = vst.msk [vmem:[%s4228_s7 + $0x1d8] sm:$0xff] %vm2218_vm15, %v2181_v5  ;;  %v2212_v50 = vadd.f32 %v4190_v9, %v2051_v16 }
 0x1df   : > { %2294 = vst.msk [vmem:[%s4228_s7 + $0x258] sm:$0xff] %vm2218_vm15, %v2197_v33  ;;  %2310 = vst.msk [vmem:[%s4228_s7 + $0x2d8] sm:$0xff] %vm2218_vm15, %v2213_v37 }
 0x1e0   : > { %2229 = vst.msk [vmem:[%s4228_s7 + $0x50] sm:$0xff] %vm2218_vm15, %v2132_v10  ;;  %2245 = vst.msk [vmem:[%s4228_s7 + $0xd0] sm:$0xff] %vm2218_vm15, %v2148_v48 }
 0x1e1   : > { %2261 = vst.msk [vmem:[%s4228_s7 + $0x150] sm:$0xff] %vm2218_vm15, %v2164_v46  ;;  %2277 = vst.msk [vmem:[%s4228_s7 + $0x1d0] sm:$0xff] %vm2218_vm15, %v2180_v8 }
 0x1e2   : > { %2293 = vst.msk [vmem:[%s4228_s7 + $0x250] sm:$0xff] %vm2218_vm15, %v2196_v1  ;;  %2309 = vst.msk [vmem:[%s4228_s7 + $0x2d0] sm:$0xff] %vm2218_vm15, %v2212_v50 }
 0x223   : > { %v2551_v39 = vpop.f32.mrb[4].mxu0 }
 0x224   : > { %v2127_v19 = vadd.f32 %v2551_v39, %v4146_v43  ;;  %v2143_v25 = vadd.f32 %v2551_v39, %v4156_v20  ;;  %v2159_v28 = vadd.f32 %v2551_v39, %v4165_v36  ;;  %v2175_v60 = vadd.f32 %v2551_v39, %v4170_v54  ;;  %v2021_v41 = vpop.f32.mrb[5].mxu0 }
 0x225   : > { %v2191_v35 = vadd.f32 %v2551_v39, %v4180_v24  ;;  %v2207_v51 = vadd.f32 %v2551_v39, %v4190_v9  ;;  %v2126_v56 = vadd.f32 %v4146_v43, %v2021_v41  ;;  %v2142_v0 = vadd.f32 %v4156_v20, %v2021_v41 }
 0x226   : > { %2224 = vst.msk [vmem:[%s4228_s7 + $0x28] sm:$0xff] %vm2218_vm15, %v2127_v19  ;;  %2240 = vst.msk [vmem:[%s4228_s7 + $0xa8] sm:$0xff] %vm2218_vm15, %v2143_v25  ;;  %v2158_v12 = vadd.f32 %v4165_v36, %v2021_v41  ;;  %v2174_v11 = vadd.f32 %v4170_v54, %v2021_v41  ;;  %v2190_v38 = vadd.f32 %v4180_v24, %v2021_v41 }
 0x227   : > { %2256 = vst.msk [vmem:[%s4228_s7 + $0x128] sm:$0xff] %vm2218_vm15, %v2159_v28  ;;  %2272 = vst.msk [vmem:[%s4228_s7 + $0x1a8] sm:$0xff] %vm2218_vm15, %v2175_v60  ;;  %v2206_v45 = vadd.f32 %v4190_v9, %v2021_v41 }
 0x228   : > { %2288 = vst.msk [vmem:[%s4228_s7 + $0x228] sm:$0xff] %vm2218_vm15, %v2191_v35  ;;  %2304 = vst.msk [vmem:[%s4228_s7 + $0x2a8] sm:$0xff] %vm2218_vm15, %v2207_v51 }
 0x229   : > { %2223 = vst.msk [vmem:[%s4228_s7 + $0x20] sm:$0xff] %vm2218_vm15, %v2126_v56  ;;  %2239 = vst.msk [vmem:[%s4228_s7 + $0xa0] sm:$0xff] %vm2218_vm15, %v2142_v0 }
 0x22a   : > { %2255 = vst.msk [vmem:[%s4228_s7 + $0x120] sm:$0xff] %vm2218_vm15, %v2158_v12  ;;  %2271 = vst.msk [vmem:[%s4228_s7 + $0x1a0] sm:$0xff] %vm2218_vm15, %v2174_v11 }
 0x22b   : > { %2287 = vst.msk [vmem:[%s4228_s7 + $0x220] sm:$0xff] %vm2218_vm15, %v2190_v38  ;;  %2303 = vst.msk [vmem:[%s4228_s7 + $0x2a0] sm:$0xff] %vm2218_vm15, %v2206_v45 }
 0x23c   : > { %v2563_v34 = vpop.f32.mrb[4].mxu1 }
 0x23d   : > { %v2135_v22 = vadd.f32 %v2563_v34, %v4146_v43  ;;  %v2151_v14 = vadd.f32 %v2563_v34, %v4156_v20  ;;  %v2167_v61 = vadd.f32 %v2563_v34, %v4165_v36  ;;  %v2183_v13 = vadd.f32 %v2563_v34, %v4170_v54  ;;  %v2061_v7 = vpop.f32.mrb[5].mxu1 }
 0x23e   : > { %v2199_v47 = vadd.f32 %v2563_v34, %v4180_v24  ;;  %v2215_v30 = vadd.f32 %v2563_v34, %v4190_v9  ;;  %v2134_v18 = vadd.f32 %v4146_v43, %v2061_v7  ;;  %v2150_v15 = vadd.f32 %v4156_v20, %v2061_v7 }
 0x23f   : > { %2232 = vst.msk [vmem:[%s4228_s7 + $0x68] sm:$0xff] %vm2218_vm15, %v2135_v22  ;;  %2248 = vst.msk [vmem:[%s4228_s7 + $0xe8] sm:$0xff] %vm2218_vm15, %v2151_v14  ;;  %v2166_v52 = vadd.f32 %v4165_v36, %v2061_v7  ;;  %v2182_v4 = vadd.f32 %v4170_v54, %v2061_v7  ;;  %v2198_v17 = vadd.f32 %v4180_v24, %v2061_v7 }
 0x240   : > { %2264 = vst.msk [vmem:[%s4228_s7 + $0x168] sm:$0xff] %vm2218_vm15, %v2167_v61  ;;  %2280 = vst.msk [vmem:[%s4228_s7 + $0x1e8] sm:$0xff] %vm2218_vm15, %v2183_v13  ;;  %v2214_v26 = vadd.f32 %v4190_v9, %v2061_v7 }
 0x241   : > { %2296 = vst.msk [vmem:[%s4228_s7 + $0x268] sm:$0xff] %vm2218_vm15, %v2199_v47  ;;  %2312 = vst.msk [vmem:[%s4228_s7 + $0x2e8] sm:$0xff] %vm2218_vm15, %v2215_v30 }
 0x242   : > { %2231 = vst.msk [vmem:[%s4228_s7 + $0x60] sm:$0xff] %vm2218_vm15, %v2134_v18  ;;  %2247 = vst.msk [vmem:[%s4228_s7 + $0xe0] sm:$0xff] %vm2218_vm15, %v2150_v15 }
 0x243   : > { %2263 = vst.msk [vmem:[%s4228_s7 + $0x160] sm:$0xff] %vm2218_vm15, %v2166_v52  ;;  %2279 = vst.msk [vmem:[%s4228_s7 + $0x1e0] sm:$0xff] %vm2218_vm15, %v2182_v4 }
 0x244   : > { %2295 = vst.msk [vmem:[%s4228_s7 + $0x260] sm:$0xff] %vm2218_vm15, %v2198_v17  ;;  %2311 = vst.msk [vmem:[%s4228_s7 + $0x2e0] sm:$0xff] %vm2218_vm15, %v2214_v26 }
 0x289   : > { %v2554_v27 = vpop.f32.mrb[6].mxu0 }
 0x28a   : > { %v2129_v63 = vadd.f32 %v2554_v27, %v4146_v43  ;;  %v2145_v62 = vadd.f32 %v2554_v27, %v4156_v20  ;;  %v2161_v21 = vadd.f32 %v2554_v27, %v4165_v36  ;;  %v2177_v23 = vadd.f32 %v2554_v27, %v4170_v54  ;;  %v2031_v57 = vpop.f32.mrb[7].mxu0 }
 0x28b   : > { %v2193_v32 = vadd.f32 %v2554_v27, %v4180_v24  ;;  %v2209_v44 = vadd.f32 %v2554_v27, %v4190_v9  ;;  %v2128_v53 = vadd.f32 %v4146_v43, %v2031_v57  ;;  %v2144_v2 = vadd.f32 %v4156_v20, %v2031_v57 }
 0x28c   : > { %2226 = vst.msk [vmem:[%s4228_s7 + $0x38] sm:$0xff] %vm2218_vm15, %v2129_v63  ;;  %2242 = vst.msk [vmem:[%s4228_s7 + $0xb8] sm:$0xff] %vm2218_vm15, %v2145_v62  ;;  %v2160_v55 = vadd.f32 %v4165_v36, %v2031_v57  ;;  %v2176_v59 = vadd.f32 %v4170_v54, %v2031_v57  ;;  %v2192_v42 = vadd.f32 %v4180_v24, %v2031_v57 }
 0x28d   : > { %2258 = vst.msk [vmem:[%s4228_s7 + $0x138] sm:$0xff] %vm2218_vm15, %v2161_v21  ;;  %2274 = vst.msk [vmem:[%s4228_s7 + $0x1b8] sm:$0xff] %vm2218_vm15, %v2177_v23  ;;  %v2208_v58 = vadd.f32 %v4190_v9, %v2031_v57 }
 0x28e   : > { %2290 = vst.msk [vmem:[%s4228_s7 + $0x238] sm:$0xff] %vm2218_vm15, %v2193_v32  ;;  %2306 = vst.msk [vmem:[%s4228_s7 + $0x2b8] sm:$0xff] %vm2218_vm15, %v2209_v44 }
 0x28f   : > { %2225 = vst.msk [vmem:[%s4228_s7 + $0x30] sm:$0xff] %vm2218_vm15, %v2128_v53  ;;  %2241 = vst.msk [vmem:[%s4228_s7 + $0xb0] sm:$0xff] %vm2218_vm15, %v2144_v2 }
 0x290   : > { %2257 = vst.msk [vmem:[%s4228_s7 + $0x130] sm:$0xff] %vm2218_vm15, %v2160_v55  ;;  %2273 = vst.msk [vmem:[%s4228_s7 + $0x1b0] sm:$0xff] %vm2218_vm15, %v2176_v59 }
 0x291   : > { %2289 = vst.msk [vmem:[%s4228_s7 + $0x230] sm:$0xff] %vm2218_vm15, %v2192_v42  ;;  %2305 = vst.msk [vmem:[%s4228_s7 + $0x2b0] sm:$0xff] %vm2218_vm15, %v2208_v58 }
 0x29f   : > { %v2566_v29 = vpop.f32.mrb[6].mxu1 }
 0x2a0   : > { %v2137_v49 = vadd.f32 %v2566_v29, %v4146_v43  ;;  %v2153_v40 = vadd.f32 %v2566_v29, %v4156_v20  ;;  %v2169_v3 = vadd.f32 %v2566_v29, %v4165_v36  ;;  %v2185_v6 = vadd.f32 %v2566_v29, %v4170_v54  ;;  %v2071_v31 = vpop.f32.mrb[7].mxu1 }
 0x2a1   : > { %v2201_v5 = vadd.f32 %v2566_v29, %v4180_v24  ;;  %v2217_v16 = vadd.f32 %v2566_v29, %v4190_v9  ;;  %v2136_v33 = vadd.f32 %v4146_v43, %v2071_v31  ;;  %v2152_v37 = vadd.f32 %v4156_v20, %v2071_v31 }
 0x2a2   : > { %2234 = vst.msk [vmem:[%s4228_s7 + $0x78] sm:$0xff] %vm2218_vm15, %v2137_v49  ;;  %2250 = vst.msk [vmem:[%s4228_s7 + $0xf8] sm:$0xff] %vm2218_vm15, %v2153_v40  ;;  %v2168_v10 = vadd.f32 %v4165_v36, %v2071_v31  ;;  %v2184_v48 = vadd.f32 %v4170_v54, %v2071_v31  ;;  %v2200_v46 = vadd.f32 %v4180_v24, %v2071_v31 }
 0x2a3   : > { %2266 = vst.msk [vmem:[%s4228_s7 + $0x178] sm:$0xff] %vm2218_vm15, %v2169_v3  ;;  %2282 = vst.msk [vmem:[%s4228_s7 + $0x1f8] sm:$0xff] %vm2218_vm15, %v2185_v6  ;;  %v2216_v43 = vadd.f32 %v4190_v9, %v2071_v31 }
 0x2a4   : > { %2298 = vst.msk [vmem:[%s4228_s7 + $0x278] sm:$0xff] %vm2218_vm15, %v2201_v5  ;;  %2314 = vst.msk [vmem:[%s4228_s7 + $0x2f8] sm:$0xff] %vm2218_vm15, %v2217_v16 }
 0x2a5   : > { %2233 = vst.msk [vmem:[%s4228_s7 + $0x70] sm:$0xff] %vm2218_vm15, %v2136_v33  ;;  %2249 = vst.msk [vmem:[%s4228_s7 + $0xf0] sm:$0xff] %vm2218_vm15, %v2152_v37 }
 0x2a6   : > { %2265 = vst.msk [vmem:[%s4228_s7 + $0x170] sm:$0xff] %vm2218_vm15, %v2168_v10  ;;  %2281 = vst.msk [vmem:[%s4228_s7 + $0x1f0] sm:$0xff] %vm2218_vm15, %v2184_v48 }
 0x2a7   : > { %2297 = vst.msk [vmem:[%s4228_s7 + $0x270] sm:$0xff] %vm2218_vm15, %v2200_v46  ;;  %2313 = vst.msk [vmem:[%s4228_s7 + $0x2f0] sm:$0xff] %vm2218_vm15, %v2216_v43 }
 0x2a8   : > { %s2517_s9 = sshll.u32 %s2857_s3, 11  ;;  %s2345_s10 = sshll.u32 %s4228_s7, 4  ;;  %s2346_s10 = int_to_ptr.vmem [resolvable:$true] %s2345_s10 }
 0x2a9   : > { %s2328_s14 = scalar_lea.hbm %s4604_s4, %s2517_s9  ;;  %s2804_s19 = smov 2048  }
 0x2aa   : > { %2640 = sst [smem:[#allocation5]] (%p2874_p5), %s2804_s19  ;;  %s2805_s11 = smov 4096  }
 0x2ab   : > { %2641 = sst [smem:[#allocation5 + $0x1]] (%p2874_p5), %s2805_s11  ;;  %s2806_s21 = smov 16  }
 0x2ac   : > { %2642 = sst [smem:[#allocation5 + $0x2]] (%p2874_p5), %s2806_s21  ;;  %s2807_s22 = smov 128  }
 0x2ad   : > { %2643 = sst [smem:[#allocation5 + $0x3]] (%p2874_p5), %s2807_s22  ;;  %s2808_s3 = smov 8  }
 0x2ae   : > { %2644 = sst [smem:[#allocation5 + $0x4]] (%p2874_p5), %s2807_s22  ;;  %s2809_s26 = smov [#allocation4]  }
 0x2af   : > { %2645 = sst [smem:[#allocation5 + $0x5]] (%p2874_p5), %s2808_s3  ;;  %s2810_s27 = smov 0  }
 0x2b0   : > { %2646 = dma.general (%p2874_p5), %s2346_s10, 12288, %s2328_s14, %s2316_s8, %s2809_s26, [#allocation5], %s2810_s27, 0  }
 0x2b1 PF: > { %p2652_p11 = scmp.ge.s32.totalorder %s2796_s18, 2  ;;  %s2373_s28 = sand.u32 1, %s2784_s15  }
 0x2b2   : > { %s2374_s29 = scalar_lea.sflag [#allocation3], %s2373_s28 }
 0x2b3   : > { %p2649_p12 = pnand %p2652_p11, %p2878_p6 }
 0x2b5   : > { %2779 = dma.done.wait (!%p2649_p12), %s2374_s29, 12288  }
 0x2b6   : > { %2781 = vsyncadd (!%p2649_p12), %s2374_s29, 4294955008  ;;  %p14_p13 = scmp.ge.s32.totalorder %s2861_s20, 4   ;;  %s4635_s15 = smov %s2788_s16 }
 0x2b7   : > { %s4636_s16 = smov %s2792_s17  ;;  %s4637_s17 = smov %s2872_s23 }
 0x2b8   : > { %s4638_s18 = smov %s2861_s20  ;;  %16 = sbr.rel (!%p14_p13) target bundleno = 3 (0x3), region = 76 }
 0x2bf   :  { %2379 = vsyncpa [#allocation3], 1 }
 0x2c0   :  { %2381 = vsyncpa [#allocation3 + $0x1], 1 }

</bundles_post_ra>
